<compile_context>
chip_gen: v6e
topology: v6e:2x2x1
jax: 0.10.0
libtpu: 0.0.40
codegen_flags: <defaults>
</compile_context>

<pallas_src>
import functools
import math

import jax
import jax.numpy as jnp
import numpy as np
from jax.experimental import pallas as pl
from jax.experimental.pallas import tpu as pltpu


def _round_up(x, m):
    return ((x + m - 1) // m) * m


def _pick_cout_tile(cout_pad, cap=256):
    """Largest multiple of 128 that divides cout_pad and is <= cap."""
    t = min(cap, cout_pad)
    t -= t % 128
    while cout_pad % t:
        t -= 128
    return t


def _pick_tile(dim, cap, align):
    """Largest tile <= cap that divides `dim` and is `align`-aligned, else `dim`."""
    if dim <= cap:
        return dim
    t = (cap // align) * align
    while t >= align:
        if dim % t == 0:
            return t
        t -= align
    return dim


# ----------------------------------------------------------------------------
# Fused 3x3 / stride-2 / pad-1 conv + bias + LeakyReLU Pallas kernel.
# Taps folded into the MXU contraction, all output rows folded into M.
# ----------------------------------------------------------------------------
def _conv3x3_s2_kernel(s_ref, w0_ref, w1_ref, b_ref, o_ref, *, m, wo, k1, slope):
    # s_ref : (1, (Ho+1)*Wo, 6*Cin) bf16  column-folded activation slab
    # w0_ref: (6*Cin, tn) bf16            taps kh in {0,1} x kw in {0,1,2}
    # w1_ref: (3*Cin, tn) bf16            taps kh == 2     x kw in {0,1,2}
    # b_ref : (1, tn) f32
    # o_ref : (1, Ho*Wo, tn)
    a0 = s_ref[0, pl.ds(0, m), :]                 # (M, 6*Cin)
    a1 = s_ref[0, pl.ds(wo, m), pl.ds(0, k1)]     # (M, 3*Cin), row-offset = Wo
    acc = jnp.dot(a0, w0_ref[...], preferred_element_type=jnp.float32)
    acc = acc + jnp.dot(a1, w1_ref[...], preferred_element_type=jnp.float32)
    acc = acc + b_ref[...]
    acc = jnp.maximum(acc, slope * acc)           # LeakyReLU (0 < slope < 1)
    o_ref[0] = acc.astype(o_ref.dtype)


def conv3x3_s2_lrelu(x, w, b, slope=0.2, out_dtype=jnp.bfloat16):
    """x: (B, H, W, Cin) NHWC; w: (3, 3, Cin, Cout) HWIO; b: (Cout,)."""
    B, H, W, Cin = x.shape
    Cout = w.shape[-1]
    # TODO(synk): PyTorch Conv2d(k=3, s=2, p=1) also handles odd H/W; this path
    # only supports the even (power-of-2) spatials used by the module.
    assert H % 2 == 0 and W % 2 == 0, "spatial dims must be even for stride-2 conv"
    Ho, Wo = H // 2, W // 2
    M = Ho * Wo

    Cout_pad = _round_up(Cout, 128)              # lane-dense output stores
    tn = _pick_cout_tile(Cout_pad, cap=256)
    n_ct = Cout_pad // tn

    # --- Column-folded activation slab S (one relayout pass, ~1.5x activations).
    xb = x.astype(jnp.bfloat16)
    xp = jnp.pad(xb, ((0, 0), (1, 1), (1, 1), (0, 0)))
    variants = []
    for rp in (0, 1):                            # row parity
        for (cp, dw) in ((0, 0), (1, 0), (0, 1)):  # (col parity, col offset) per kw
            plane = xp[:, rp::2, cp::2, :]       # (B, Ho+1, Wo+1, Cin)
            variants.append(plane[:, :, dw:dw + Wo, :])  # (B, Ho+1, Wo, Cin)
    S = jnp.concatenate(variants, axis=-1)       # (B, Ho+1, Wo, 6*Cin)
    S = S.reshape(B, (Ho + 1) * Wo, 6 * Cin)     # contiguous (free) reshape

    # --- Weights folded along K to match S's channel blocks; Cout padded to 128.
    wf = w.astype(jnp.float32)
    w0 = jnp.concatenate([wf[0, 0], wf[0, 1], wf[0, 2],
                          wf[1, 0], wf[1, 1], wf[1, 2]], axis=0)   # (6*Cin, Cout)
    w1 = jnp.concatenate([wf[2, 0], wf[2, 1], wf[2, 2]], axis=0)   # (3*Cin, Cout)
    pad_n = Cout_pad - Cout
    w0 = jnp.pad(w0, ((0, 0), (0, pad_n))).astype(jnp.bfloat16)
    w1 = jnp.pad(w1, ((0, 0), (0, pad_n))).astype(jnp.bfloat16)
    b2 = jnp.pad(b.astype(jnp.float32), (0, pad_n)).reshape(1, Cout_pad)

    # --- Grid order: keep the dominant operand resident across the inner axis.
    weight_bytes = 9 * Cin * Cout_pad * 2
    act_bytes = (Ho + 1) * Wo * 6 * Cin * 2      # per batch element
    if weight_bytes > act_bytes:
        grid = (n_ct, B)                         # weights resident across batch
        s_map = lambda j, bi: (bi, 0, 0)
        w_map = lambda j, bi: (0, j)
        b_map = lambda j, bi: (0, j)
        o_map = lambda j, bi: (bi, 0, j)
    else:
        grid = (B, n_ct)                         # activations resident across Cout
        s_map = lambda bi, j: (bi, 0, 0)
        w_map = lambda bi, j: (0, j)
        b_map = lambda bi, j: (0, j)
        o_map = lambda bi, j: (bi, 0, j)

    kernel = functools.partial(_conv3x3_s2_kernel, m=M, wo=Wo, k1=3 * Cin, slope=slope)
    out = pl.pallas_call(
        kernel,
        out_shape=jax.ShapeDtypeStruct((B, M, Cout_pad), out_dtype),
        grid=grid,
        in_specs=[
            pl.BlockSpec((1, (Ho + 1) * Wo, 6 * Cin), s_map),
            pl.BlockSpec((6 * Cin, tn), w_map),
            pl.BlockSpec((3 * Cin, tn), w_map),
            pl.BlockSpec((1, tn), b_map),
        ],
        out_specs=pl.BlockSpec((1, M, tn), o_map),
        compiler_params=pltpu.CompilerParams(
            dimension_semantics=("parallel", "parallel"),
            vmem_limit_bytes=32 * 1024 * 1024,
        ),
    )(S, w0, w1, b2)

    out = out.reshape(B, Ho, Wo, Cout_pad)
    if Cout_pad != Cout:
        out = out[..., :Cout]
    return out


# ----------------------------------------------------------------------------
# Stacked tiled matmul: T independent (M,K)@(K,N)+b problems in one pallas_call.
# Tile caps chosen so K fits one block (no multi-step accumulation in practice).
# ----------------------------------------------------------------------------
def _stacked_mm_kernel(x_ref, w_ref, b_ref, o_ref, acc_ref, *, slope):
    k = pl.program_id(3)

    @pl.when(k == 0)
    def _init():
        acc_ref[...] = jnp.zeros_like(acc_ref)

    acc_ref[...] += jnp.dot(x_ref[0], w_ref[0], preferred_element_type=jnp.float32)

    @pl.when(k == pl.num_programs(3) - 1)
    def _epilogue():
        acc = acc_ref[...] + b_ref[0]
        if slope is not None:
            acc = jnp.maximum(acc, slope * acc)
        o_ref[0] = acc.astype(o_ref.dtype)


def stacked_matmul_bias_act(x, w, b, slope=None, out_dtype=jnp.float32):
    """x: (T, M, K); w: (T, K, N); b: (T, N) -> (T, M, N).  f32 MXU inputs."""
    T, M, K = x.shape
    _, _, N = w.shape
    tm = _pick_tile(M, cap=256, align=8)
    tn = _pick_tile(N, cap=512, align=128)
    tk = _pick_tile(K, cap=1024, align=128)
    grid = (T, M // tm, N // tn, K // tk)
    kernel = functools.partial(_stacked_mm_kernel, slope=slope)
    return pl.pallas_call(
        kernel,
        out_shape=jax.ShapeDtypeStruct((T, M, N), out_dtype),
        grid=grid,
        in_specs=[
            pl.BlockSpec((1, tm, tk), lambda t, i, j, k: (t, i, k)),
            pl.BlockSpec((1, tk, tn), lambda t, i, j, k: (t, k, j)),
            pl.BlockSpec((1, 1, tn), lambda t, i, j, k: (t, 0, j)),
        ],
        out_specs=pl.BlockSpec((1, tm, tn), lambda t, i, j, k: (t, i, j)),
        scratch_shapes=[pltpu.VMEM((tm, tn), jnp.float32)],
        compiler_params=pltpu.CompilerParams(
            dimension_semantics=("parallel", "parallel", "parallel", "arbitrary"),
            vmem_limit_bytes=32 * 1024 * 1024,
        ),
    )(x.astype(jnp.float32), w.astype(jnp.float32),
      b.reshape(T, 1, N).astype(jnp.float32))


# ----------------------------------------------------------------------------
# Parameter construction (deterministic, synthetic).
# ----------------------------------------------------------------------------
def _conv_params(key, cin, cout, scale=0.1):
    kw_, kb_ = jax.random.split(key)
    w = scale * jax.random.normal(kw_, (3, 3, cin, cout), jnp.float32)
    b = scale * jax.random.normal(kb_, (cout,), jnp.float32)
    return w, b


def _linear_params(key, cin, cout, scale=0.1):
    kw_, kb_ = jax.random.split(key)
    w = scale * jax.random.normal(kw_, (cin, cout), jnp.float32)
    b = scale * jax.random.normal(kb_, (cout,), jnp.float32)
    return w, b


def init_gradual_style_block(key, in_c, out_c, spatial):
    num_pools = int(math.log2(spatial))
    keys = list(jax.random.split(key, 16 + 2 * max(num_pools - 5, 0)))
    ki = iter(keys)
    params = {}
    if num_pools > 4:
        params["conv_first"] = _conv_params(next(ki), in_c, in_c)
        params["convs"] = [_conv_params(next(ki), in_c, in_c)
                           for _ in range(num_pools - 5)]
    else:
        params["conv_first"] = None
        params["convs"] = None
    chans = [(in_c, in_c), (in_c, 2 * in_c), (2 * in_c, 4 * in_c), (4 * in_c, 8 * in_c)]
    params["convs1"] = [_conv_params(next(ki), ci, co) for ci, co in chans]
    params["convs2"] = [_conv_params(next(ki), ci, co) for ci, co in chans]
    params["linear1"] = _linear_params(next(ki), out_c, out_c)
    params["linear2"] = _linear_params(next(ki), out_c, out_c)
    return params


# ----------------------------------------------------------------------------
# Forward pass (mirrors GradualStyleBlock.forward).
# ----------------------------------------------------------------------------
def gradual_style_block_forward(x, params, out_c):
    """x: (N, H, W, in_c) NHWC float32.  Returns (fea, x1, x2)."""
    if params["convs"] is not None:
        fea = conv3x3_s2_lrelu(x, *params["conv_first"])
        h = fea
        for w, b in params["convs"]:
            h = conv3x3_s2_lrelu(h, w, b)
    else:
        fea = None
        h = x

    # First level of both towers shares input h -> concat weights along Cout
    # (one launch, doubled output lane density), then split.
    (w1a, b1a) = params["convs1"][0]
    (w2a, b2a) = params["convs2"][0]
    c1 = w1a.shape[-1]
    y = conv3x3_s2_lrelu(h,
                         jnp.concatenate([w1a, w2a], axis=-1),
                         jnp.concatenate([b1a, b2a], axis=0))
    x1 = y[..., :c1]
    x2 = y[..., c1:]
    for w, b in params["convs1"][1:]:
        x1 = conv3x3_s2_lrelu(x1, w, b)
    for w, b in params["convs2"][1:]:
        x2 = conv3x3_s2_lrelu(x2, w, b)

    # Flatten: the view(-1, out_c) in the reference assumes 1x1 final spatial.
    assert x1.shape[1] == 1 and x1.shape[2] == 1 and x1.shape[3] == out_c, (
        "final conv output must be (N, 1, 1, out_c) for view(-1, out_c)")
    x1 = x1.reshape(-1, out_c)
    x2 = x2.reshape(-1, out_c)

    # Both trailing Linear layers fused into a single stacked-matmul pallas_call.
    xs = jnp.stack([x1, x2], axis=0)
    ws = jnp.stack([params["linear1"][0], params["linear2"][0]], axis=0)
    bs = jnp.stack([params["linear1"][1], params["linear2"][1]], axis=0)
    ys = stacked_matmul_bias_act(xs, ws, bs, slope=None)
    y1, y2 = ys[0], ys[1]

    if fea is not None:
        fea = fea.astype(jnp.float32)
    return fea, y1, y2


# ----------------------------------------------------------------------------
# Plain-JAX reference (f32) for a numerical sanity check.
# ----------------------------------------------------------------------------
def _reference_forward(x, params, out_c):
    def conv_ref(h, w, b):
        y = jax.lax.conv_general_dilated(
            h, w, window_strides=(2, 2), padding=((1, 1), (1, 1)),
            dimension_numbers=("NHWC", "HWIO", "NHWC"))
        y = y + b.reshape(1, 1, 1, -1)
        return jnp.where(y >= 0, y, 0.2 * y)

    if params["convs"] is not None:
        fea = conv_ref(x, *params["conv_first"])
        h = fea
        for w, b in params["convs"]:
            h = conv_ref(h, w, b)
    else:
        fea, h = None, x
    x1, x2 = h, h
    for w, b in params["convs1"]:
        x1 = conv_ref(x1, w, b)
    for w, b in params["convs2"]:
        x2 = conv_ref(x2, w, b)
    x1 = x1.reshape(-1, out_c) @ params["linear1"][0] + params["linear1"][1]
    x2 = x2.reshape(-1, out_c) @ params["linear2"][0] + params["linear2"][1]
    return fea, x1, x2


if __name__ == "__main__":
    # Small shapes consistent with the module: in_c=4, out_c=8*in_c=32, spatial=32
    # -> num_pools=5 (>4, so conv_first is exercised; `convs` is an empty Sequential).
    batch, in_c, spatial = 2, 4, 32
    out_c = 8 * in_c

    key = jax.random.PRNGKey(0)
    k_x, k_p = jax.random.split(key)
    x = jax.random.normal(k_x, (batch, spatial, spatial, in_c), jnp.float32)
    params = init_gradual_style_block(k_p, in_c, out_c, spatial)

    fwd = jax.jit(lambda xx, pp: gradual_style_block_forward(xx, pp, out_c))
    fea, x1, x2 = fwd(x, params)
    jax.block_until_ready(x1)
    jax.block_until_ready(x2)
    if fea is not None:
        jax.block_until_ready(fea)

    assert fea.shape == (batch, spatial // 2, spatial // 2, in_c)
    assert x1.shape == (batch, out_c)
    assert x2.shape == (batch, out_c)

    # Numerical sanity check against a plain-JAX f32 reference (loose tolerance
    # because the conv path feeds the MXU with bf16 inputs).
    fea_r, x1_r, x2_r = _reference_forward(x, params, out_c)
    np.testing.assert_allclose(np.asarray(fea), np.asarray(fea_r), rtol=0.1, atol=0.1)
    np.testing.assert_allclose(np.asarray(x1), np.asarray(x1_r), rtol=0.1, atol=0.1)
    np.testing.assert_allclose(np.asarray(x2), np.asarray(x2_r), rtol=0.1, atol=0.1)

    print("KERNEL_OK")
</pallas_src>

<mosaic_0001>
module attributes {stable_mosaic.version = 11 : i64} {
  func.func @_conv3x3_s2_kernel(%arg0: i32, %arg1: i32, %arg2: memref<1x272x24xbf16, #tpu.memory_space<vmem>>, %arg3: memref<24x128xbf16, #tpu.memory_space<vmem>>, %arg4: memref<12x128xbf16, #tpu.memory_space<vmem>>, %arg5: memref<1x128xf32, #tpu.memory_space<vmem>>, %arg6: memref<1x256x128xbf16, #tpu.memory_space<vmem>>) attributes {dimension_semantics = [#tpu.dimension_semantics<parallel>, #tpu.dimension_semantics<parallel>], iteration_bounds = array<i64: 2, 1>, scalar_prefetch = 0 : i64, scratch_operands = 0 : i64, tpu.core_type = #tpu.core_type<tc>, window_params = [{transform_indices = @transform_0, window_bounds = array<i64: 1, 272, 24>}, {transform_indices = @transform_1, window_bounds = array<i64: 24, 128>}, {transform_indices = @transform_2, window_bounds = array<i64: 12, 128>}, {transform_indices = @transform_3, window_bounds = array<i64: 1, 128>}, {transform_indices = @transform_4, window_bounds = array<i64: 1, 256, 128>}]} {
    %c0 = arith.constant 0 : index
    %c0_0 = arith.constant 0 : index
    %c0_1 = arith.constant 0 : index
    %0 = vector.load %arg2[%c0, %c0_0, %c0_1] : memref<1x272x24xbf16, #tpu.memory_space<vmem>>, vector<1x256x24xbf16>
    %1 = vector.shape_cast %0 : vector<1x256x24xbf16> to vector<256x24xbf16>
    %c0_2 = arith.constant 0 : index
    %c16 = arith.constant 16 : index
    %c0_3 = arith.constant 0 : index
    %2 = vector.load %arg2[%c0_2, %c16, %c0_3] : memref<1x272x24xbf16, #tpu.memory_space<vmem>>, vector<1x256x12xbf16>
    %3 = vector.shape_cast %2 : vector<1x256x12xbf16> to vector<256x12xbf16>
    %c0_4 = arith.constant 0 : index
    %c0_5 = arith.constant 0 : index
    %4 = vector.load %arg3[%c0_4, %c0_5] : memref<24x128xbf16, #tpu.memory_space<vmem>>, vector<24x128xbf16>
    %cst = arith.constant dense<0.000000e+00> : vector<256x128xf32>
    %5 = tpu.matmul %1, %4, %cst {dimension_numbers = #tpu.dot_dimension_numbers<[1], [0], [0], [1], [0, 0, 1, 1], [], []>} : vector<256x24xbf16>, vector<24x128xbf16>, vector<256x128xf32> -> vector<256x128xf32>
    %c0_6 = arith.constant 0 : index
    %c0_7 = arith.constant 0 : index
    %6 = vector.load %arg4[%c0_6, %c0_7] : memref<12x128xbf16, #tpu.memory_space<vmem>>, vector<12x128xbf16>
    %cst_8 = arith.constant dense<0.000000e+00> : vector<256x128xf32>
    %7 = tpu.matmul %3, %6, %cst_8 {dimension_numbers = #tpu.dot_dimension_numbers<[1], [0], [0], [1], [0, 0, 1, 1], [], []>} : vector<256x12xbf16>, vector<12x128xbf16>, vector<256x128xf32> -> vector<256x128xf32>
    %8 = arith.addf %5, %7 : vector<256x128xf32>
    %c0_9 = arith.constant 0 : index
    %c0_10 = arith.constant 0 : index
    %9 = vector.load %arg5[%c0_9, %c0_10] : memref<1x128xf32, #tpu.memory_space<vmem>>, vector<1x128xf32>
    %10 = vector.broadcast %9 : vector<1x128xf32> to vector<256x128xf32>
    %11 = arith.addf %8, %10 : vector<256x128xf32>
    %cst_11 = arith.constant 2.000000e-01 : f32
    %12 = vector.broadcast %cst_11 : f32 to vector<256x128xf32>
    %13 = arith.mulf %12, %11 : vector<256x128xf32>
    %14 = arith.maximumf %11, %13 : vector<256x128xf32>
    %15 = arith.truncf %14 : vector<256x128xf32> to vector<256x128xbf16>
    %c0_12 = arith.constant 0 : index
    %c0_13 = arith.constant 0 : index
    %c0_14 = arith.constant 0 : index
    %16 = vector.load %arg6[%c0_12, %c0_13, %c0_14] : memref<1x256x128xbf16, #tpu.memory_space<vmem>>, vector<1x256x128xbf16>
    %17 = vector.shape_cast %16 : vector<1x256x128xbf16> to vector<256x128xbf16>
    %18 = vector.shape_cast %15 : vector<256x128xbf16> to vector<1x256x128xbf16>
    tpu.vector_store %arg6[%c0_12, %c0_13, %c0_14], %18 {strides = array<i32>} : memref<1x256x128xbf16, #tpu.memory_space<vmem>>, vector<1x256x128xbf16>,
    return
  }
  func.func @transform_0(%arg0: i32, %arg1: i32) -> (i32, i32, i32) {
    %c0_i32 = arith.constant 0 : i32
    %c0_i32_0 = arith.constant 0 : i32
    %c0_i32_1 = arith.constant 0 : i32
    return %arg0, %c0_i32, %c0_i32_0 : i32, i32, i32
  }
  func.func @transform_1(%arg0: i32, %arg1: i32) -> (i32, i32) {
    %c0_i32 = arith.constant 0 : i32
    %c0_i32_0 = arith.constant 0 : i32
    return %c0_i32, %arg1 : i32, i32
  }
  func.func @transform_2(%arg0: i32, %arg1: i32) -> (i32, i32) {
    %c0_i32 = arith.constant 0 : i32
    %c0_i32_0 = arith.constant 0 : i32
    return %c0_i32, %arg1 : i32, i32
  }
  func.func @transform_3(%arg0: i32, %arg1: i32) -> (i32, i32) {
    %c0_i32 = arith.constant 0 : i32
    %c0_i32_0 = arith.constant 0 : i32
    return %c0_i32, %arg1 : i32, i32
  }
  func.func @transform_4(%arg0: i32, %arg1: i32) -> (i32, i32, i32) {
    %c0_i32 = arith.constant 0 : i32
    %c0_i32_0 = arith.constant 0 : i32
    return %arg0, %c0_i32, %arg1 : i32, i32, i32
  }
}

module attributes {stable_mosaic.version = 11 : i64} {
  func.func @_conv3x3_s2_kernel(%arg0: i32, %arg1: i32, %arg2: memref<1x72x24xbf16, #tpu.memory_space<vmem>>, %arg3: memref<24x128xbf16, #tpu.memory_space<vmem>>, %arg4: memref<12x128xbf16, #tpu.memory_space<vmem>>, %arg5: memref<1x128xf32, #tpu.memory_space<vmem>>, %arg6: memref<1x64x128xbf16, #tpu.memory_space<vmem>>) attributes {dimension_semantics = [#tpu.dimension_semantics<parallel>, #tpu.dimension_semantics<parallel>], iteration_bounds = array<i64: 1, 2>, scalar_prefetch = 0 : i64, scratch_operands = 0 : i64, tpu.core_type = #tpu.core_type<tc>, window_params = [{transform_indices = @transform_0, window_bounds = array<i64: 1, 72, 24>}, {transform_indices = @transform_1, window_bounds = array<i64: 24, 128>}, {transform_indices = @transform_2, window_bounds = array<i64: 12, 128>}, {transform_indices = @transform_3, window_bounds = array<i64: 1, 128>}, {transform_indices = @transform_4, window_bounds = array<i64: 1, 64, 128>}]} {
    %c0 = arith.constant 0 : index
    %c0_0 = arith.constant 0 : index
    %c0_1 = arith.constant 0 : index
    %0 = vector.load %arg2[%c0, %c0_0, %c0_1] : memref<1x72x24xbf16, #tpu.memory_space<vmem>>, vector<1x64x24xbf16>
    %1 = vector.shape_cast %0 : vector<1x64x24xbf16> to vector<64x24xbf16>
    %c0_2 = arith.constant 0 : index
    %c8 = arith.constant 8 : index
    %c0_3 = arith.constant 0 : index
    %2 = vector.load %arg2[%c0_2, %c8, %c0_3] : memref<1x72x24xbf16, #tpu.memory_space<vmem>>, vector<1x64x12xbf16>
    %3 = vector.shape_cast %2 : vector<1x64x12xbf16> to vector<64x12xbf16>
    %c0_4 = arith.constant 0 : index
    %c0_5 = arith.constant 0 : index
    %4 = vector.load %arg3[%c0_4, %c0_5] : memref<24x128xbf16, #tpu.memory_space<vmem>>, vector<24x128xbf16>
    %cst = arith.constant dense<0.000000e+00> : vector<64x128xf32>
    %5 = tpu.matmul %1, %4, %cst {dimension_numbers = #tpu.dot_dimension_numbers<[1], [0], [0], [1], [0, 0, 1, 1], [], []>} : vector<64x24xbf16>, vector<24x128xbf16>, vector<64x128xf32> -> vector<64x128xf32>
    %c0_6 = arith.constant 0 : index
    %c0_7 = arith.constant 0 : index
    %6 = vector.load %arg4[%c0_6, %c0_7] : memref<12x128xbf16, #tpu.memory_space<vmem>>, vector<12x128xbf16>
    %cst_8 = arith.constant dense<0.000000e+00> : vector<64x128xf32>
    %7 = tpu.matmul %3, %6, %cst_8 {dimension_numbers = #tpu.dot_dimension_numbers<[1], [0], [0], [1], [0, 0, 1, 1], [], []>} : vector<64x12xbf16>, vector<12x128xbf16>, vector<64x128xf32> -> vector<64x128xf32>
    %8 = arith.addf %5, %7 : vector<64x128xf32>
    %c0_9 = arith.constant 0 : index
    %c0_10 = arith.constant 0 : index
    %9 = vector.load %arg5[%c0_9, %c0_10] : memref<1x128xf32, #tpu.memory_space<vmem>>, vector<1x128xf32>
    %10 = vector.broadcast %9 : vector<1x128xf32> to vector<64x128xf32>
    %11 = arith.addf %8, %10 : vector<64x128xf32>
    %cst_11 = arith.constant 2.000000e-01 : f32
    %12 = vector.broadcast %cst_11 : f32 to vector<64x128xf32>
    %13 = arith.mulf %12, %11 : vector<64x128xf32>
    %14 = arith.maximumf %11, %13 : vector<64x128xf32>
    %15 = arith.truncf %14 : vector<64x128xf32> to vector<64x128xbf16>
    %c0_12 = arith.constant 0 : index
    %c0_13 = arith.constant 0 : index
    %c0_14 = arith.constant 0 : index
    %16 = vector.load %arg6[%c0_12, %c0_13, %c0_14] : memref<1x64x128xbf16, #tpu.memory_space<vmem>>, vector<1x64x128xbf16>
    %17 = vector.shape_cast %16 : vector<1x64x128xbf16> to vector<64x128xbf16>
    %18 = vector.shape_cast %15 : vector<64x128xbf16> to vector<1x64x128xbf16>
    tpu.vector_store %arg6[%c0_12, %c0_13, %c0_14], %18 {strides = array<i32>} : memref<1x64x128xbf16, #tpu.memory_space<vmem>>, vector<1x64x128xbf16>,
    return
  }
  func.func @transform_0(%arg0: i32, %arg1: i32) -> (i32, i32, i32) {
    %c0_i32 = arith.constant 0 : i32
    %c0_i32_0 = arith.constant 0 : i32
    %c0_i32_1 = arith.constant 0 : i32
    return %arg1, %c0_i32, %c0_i32_0 : i32, i32, i32
  }
  func.func @transform_1(%arg0: i32, %arg1: i32) -> (i32, i32) {
    %c0_i32 = arith.constant 0 : i32
    %c0_i32_0 = arith.constant 0 : i32
    return %c0_i32, %arg0 : i32, i32
  }
  func.func @transform_2(%arg0: i32, %arg1: i32) -> (i32, i32) {
    %c0_i32 = arith.constant 0 : i32
    %c0_i32_0 = arith.constant 0 : i32
    return %c0_i32, %arg0 : i32, i32
  }
  func.func @transform_3(%arg0: i32, %arg1: i32) -> (i32, i32) {
    %c0_i32 = arith.constant 0 : i32
    %c0_i32_0 = arith.constant 0 : i32
    return %c0_i32, %arg0 : i32, i32
  }
  func.func @transform_4(%arg0: i32, %arg1: i32) -> (i32, i32, i32) {
    %c0_i32 = arith.constant 0 : i32
    %c0_i32_0 = arith.constant 0 : i32
    return %arg1, %c0_i32, %arg0 : i32, i32, i32
  }
}

module attributes {stable_mosaic.version = 11 : i64} {
  func.func @_conv3x3_s2_kernel(%arg0: i32, %arg1: i32, %arg2: memref<1x20x24xbf16, #tpu.memory_space<vmem>>, %arg3: memref<24x128xbf16, #tpu.memory_space<vmem>>, %arg4: memref<12x128xbf16, #tpu.memory_space<vmem>>, %arg5: memref<1x128xf32, #tpu.memory_space<vmem>>, %arg6: memref<1x16x128xbf16, #tpu.memory_space<vmem>>) attributes {dimension_semantics = [#tpu.dimension_semantics<parallel>, #tpu.dimension_semantics<parallel>], iteration_bounds = array<i64: 1, 2>, scalar_prefetch = 0 : i64, scratch_operands = 0 : i64, tpu.core_type = #tpu.core_type<tc>, window_params = [{transform_indices = @transform_0, window_bounds = array<i64: 1, 20, 24>}, {transform_indices = @transform_1, window_bounds = array<i64: 24, 128>}, {transform_indices = @transform_2, window_bounds = array<i64: 12, 128>}, {transform_indices = @transform_3, window_bounds = array<i64: 1, 128>}, {transform_indices = @transform_4, window_bounds = array<i64: 1, 16, 128>}]} {
    %c0 = arith.constant 0 : index
    %c0_0 = arith.constant 0 : index
    %c0_1 = arith.constant 0 : index
    %0 = vector.load %arg2[%c0, %c0_0, %c0_1] : memref<1x20x24xbf16, #tpu.memory_space<vmem>>, vector<1x16x24xbf16>
    %1 = vector.shape_cast %0 : vector<1x16x24xbf16> to vector<16x24xbf16>
    %c0_2 = arith.constant 0 : index
    %c4 = arith.constant 4 : index
    %c0_3 = arith.constant 0 : index
    %2 = vector.load %arg2[%c0_2, %c4, %c0_3] : memref<1x20x24xbf16, #tpu.memory_space<vmem>>, vector<1x16x12xbf16>
    %3 = vector.shape_cast %2 : vector<1x16x12xbf16> to vector<16x12xbf16>
    %c0_4 = arith.constant 0 : index
    %c0_5 = arith.constant 0 : index
    %4 = vector.load %arg3[%c0_4, %c0_5] : memref<24x128xbf16, #tpu.memory_space<vmem>>, vector<24x128xbf16>
    %cst = arith.constant dense<0.000000e+00> : vector<16x128xf32>
    %5 = tpu.matmul %1, %4, %cst {dimension_numbers = #tpu.dot_dimension_numbers<[1], [0], [0], [1], [0, 0, 1, 1], [], []>} : vector<16x24xbf16>, vector<24x128xbf16>, vector<16x128xf32> -> vector<16x128xf32>
    %c0_6 = arith.constant 0 : index
    %c0_7 = arith.constant 0 : index
    %6 = vector.load %arg4[%c0_6, %c0_7] : memref<12x128xbf16, #tpu.memory_space<vmem>>, vector<12x128xbf16>
    %cst_8 = arith.constant dense<0.000000e+00> : vector<16x128xf32>
    %7 = tpu.matmul %3, %6, %cst_8 {dimension_numbers = #tpu.dot_dimension_numbers<[1], [0], [0], [1], [0, 0, 1, 1], [], []>} : vector<16x12xbf16>, vector<12x128xbf16>, vector<16x128xf32> -> vector<16x128xf32>
    %8 = arith.addf %5, %7 : vector<16x128xf32>
    %c0_9 = arith.constant 0 : index
    %c0_10 = arith.constant 0 : index
    %9 = vector.load %arg5[%c0_9, %c0_10] : memref<1x128xf32, #tpu.memory_space<vmem>>, vector<1x128xf32>
    %10 = vector.broadcast %9 : vector<1x128xf32> to vector<16x128xf32>
    %11 = arith.addf %8, %10 : vector<16x128xf32>
    %cst_11 = arith.constant 2.000000e-01 : f32
    %12 = vector.broadcast %cst_11 : f32 to vector<16x128xf32>
    %13 = arith.mulf %12, %11 : vector<16x128xf32>
    %14 = arith.maximumf %11, %13 : vector<16x128xf32>
    %15 = arith.truncf %14 : vector<16x128xf32> to vector<16x128xbf16>
    %c0_12 = arith.constant 0 : index
    %c0_13 = arith.constant 0 : index
    %c0_14 = arith.constant 0 : index
    %16 = vector.load %arg6[%c0_12, %c0_13, %c0_14] : memref<1x16x128xbf16, #tpu.memory_space<vmem>>, vector<1x16x128xbf16>
    %17 = vector.shape_cast %16 : vector<1x16x128xbf16> to vector<16x128xbf16>
    %18 = vector.shape_cast %15 : vector<16x128xbf16> to vector<1x16x128xbf16>
    tpu.vector_store %arg6[%c0_12, %c0_13, %c0_14], %18 {strides = array<i32>} : memref<1x16x128xbf16, #tpu.memory_space<vmem>>, vector<1x16x128xbf16>,
    return
  }
  func.func @transform_0(%arg0: i32, %arg1: i32) -> (i32, i32, i32) {
    %c0_i32 = arith.constant 0 : i32
    %c0_i32_0 = arith.constant 0 : i32
    %c0_i32_1 = arith.constant 0 : i32
    return %arg1, %c0_i32, %c0_i32_0 : i32, i32, i32
  }
  func.func @transform_1(%arg0: i32, %arg1: i32) -> (i32, i32) {
    %c0_i32 = arith.constant 0 : i32
    %c0_i32_0 = arith.constant 0 : i32
    return %c0_i32, %arg0 : i32, i32
  }
  func.func @transform_2(%arg0: i32, %arg1: i32) -> (i32, i32) {
    %c0_i32 = arith.constant 0 : i32
    %c0_i32_0 = arith.constant 0 : i32
    return %c0_i32, %arg0 : i32, i32
  }
  func.func @transform_3(%arg0: i32, %arg1: i32) -> (i32, i32) {
    %c0_i32 = arith.constant 0 : i32
    %c0_i32_0 = arith.constant 0 : i32
    return %c0_i32, %arg0 : i32, i32
  }
  func.func @transform_4(%arg0: i32, %arg1: i32) -> (i32, i32, i32) {
    %c0_i32 = arith.constant 0 : i32
    %c0_i32_0 = arith.constant 0 : i32
    return %arg1, %c0_i32, %arg0 : i32, i32, i32
  }
}

module attributes {stable_mosaic.version = 11 : i64} {
  func.func @_conv3x3_s2_kernel(%arg0: i32, %arg1: i32, %arg2: memref<1x6x48xbf16, #tpu.memory_space<vmem>>, %arg3: memref<48x128xbf16, #tpu.memory_space<vmem>>, %arg4: memref<24x128xbf16, #tpu.memory_space<vmem>>, %arg5: memref<1x128xf32, #tpu.memory_space<vmem>>, %arg6: memref<1x4x128xbf16, #tpu.memory_space<vmem>>) attributes {dimension_semantics = [#tpu.dimension_semantics<parallel>, #tpu.dimension_semantics<parallel>], iteration_bounds = array<i64: 1, 2>, scalar_prefetch = 0 : i64, scratch_operands = 0 : i64, tpu.core_type = #tpu.core_type<tc>, window_params = [{transform_indices = @transform_0, window_bounds = array<i64: 1, 6, 48>}, {transform_indices = @transform_1, window_bounds = array<i64: 48, 128>}, {transform_indices = @transform_2, window_bounds = array<i64: 24, 128>}, {transform_indices = @transform_3, window_bounds = array<i64: 1, 128>}, {transform_indices = @transform_4, window_bounds = array<i64: 1, 4, 128>}]} {
    %c0 = arith.constant 0 : index
    %c0_0 = arith.constant 0 : index
    %c0_1 = arith.constant 0 : index
    %0 = vector.load %arg2[%c0, %c0_0, %c0_1] : memref<1x6x48xbf16, #tpu.memory_space<vmem>>, vector<1x4x48xbf16>
    %1 = vector.shape_cast %0 : vector<1x4x48xbf16> to vector<4x48xbf16>
    %c0_2 = arith.constant 0 : index
    %c2 = arith.constant 2 : index
    %c0_3 = arith.constant 0 : index
    %2 = vector.load %arg2[%c0_2, %c2, %c0_3] : memref<1x6x48xbf16, #tpu.memory_space<vmem>>, vector<1x4x24xbf16>
    %3 = vector.shape_cast %2 : vector<1x4x24xbf16> to vector<4x24xbf16>
    %c0_4 = arith.constant 0 : index
    %c0_5 = arith.constant 0 : index
    %4 = vector.load %arg3[%c0_4, %c0_5] : memref<48x128xbf16, #tpu.memory_space<vmem>>, vector<48x128xbf16>
    %cst = arith.constant dense<0.000000e+00> : vector<4x128xf32>
    %5 = tpu.matmul %1, %4, %cst {dimension_numbers = #tpu.dot_dimension_numbers<[1], [0], [0], [1], [0, 0, 1, 1], [], []>} : vector<4x48xbf16>, vector<48x128xbf16>, vector<4x128xf32> -> vector<4x128xf32>
    %c0_6 = arith.constant 0 : index
    %c0_7 = arith.constant 0 : index
    %6 = vector.load %arg4[%c0_6, %c0_7] : memref<24x128xbf16, #tpu.memory_space<vmem>>, vector<24x128xbf16>
    %cst_8 = arith.constant dense<0.000000e+00> : vector<4x128xf32>
    %7 = tpu.matmul %3, %6, %cst_8 {dimension_numbers = #tpu.dot_dimension_numbers<[1], [0], [0], [1], [0, 0, 1, 1], [], []>} : vector<4x24xbf16>, vector<24x128xbf16>, vector<4x128xf32> -> vector<4x128xf32>
    %8 = arith.addf %5, %7 : vector<4x128xf32>
    %c0_9 = arith.constant 0 : index
    %c0_10 = arith.constant 0 : index
    %9 = vector.load %arg5[%c0_9, %c0_10] : memref<1x128xf32, #tpu.memory_space<vmem>>, vector<1x128xf32>
    %10 = vector.broadcast %9 : vector<1x128xf32> to vector<4x128xf32>
    %11 = arith.addf %8, %10 : vector<4x128xf32>
    %cst_11 = arith.constant 2.000000e-01 : f32
    %12 = vector.broadcast %cst_11 : f32 to vector<4x128xf32>
    %13 = arith.mulf %12, %11 : vector<4x128xf32>
    %14 = arith.maximumf %11, %13 : vector<4x128xf32>
    %15 = arith.truncf %14 : vector<4x128xf32> to vector<4x128xbf16>
    %c0_12 = arith.constant 0 : index
    %c0_13 = arith.constant 0 : index
    %c0_14 = arith.constant 0 : index
    %16 = vector.load %arg6[%c0_12, %c0_13, %c0_14] : memref<1x4x128xbf16, #tpu.memory_space<vmem>>, vector<1x4x128xbf16>
    %17 = vector.shape_cast %16 : vector<1x4x128xbf16> to vector<4x128xbf16>
    %18 = vector.shape_cast %15 : vector<4x128xbf16> to vector<1x4x128xbf16>
    tpu.vector_store %arg6[%c0_12, %c0_13, %c0_14], %18 {strides = array<i32>} : memref<1x4x128xbf16, #tpu.memory_space<vmem>>, vector<1x4x128xbf16>,
    return
  }
  func.func @transform_0(%arg0: i32, %arg1: i32) -> (i32, i32, i32) {
    %c0_i32 = arith.constant 0 : i32
    %c0_i32_0 = arith.constant 0 : i32
    %c0_i32_1 = arith.constant 0 : i32
    return %arg1, %c0_i32, %c0_i32_0 : i32, i32, i32
  }
  func.func @transform_1(%arg0: i32, %arg1: i32) -> (i32, i32) {
    %c0_i32 = arith.constant 0 : i32
    %c0_i32_0 = arith.constant 0 : i32
    return %c0_i32, %arg0 : i32, i32
  }
  func.func @transform_2(%arg0: i32, %arg1: i32) -> (i32, i32) {
    %c0_i32 = arith.constant 0 : i32
    %c0_i32_0 = arith.constant 0 : i32
    return %c0_i32, %arg0 : i32, i32
  }
  func.func @transform_3(%arg0: i32, %arg1: i32) -> (i32, i32) {
    %c0_i32 = arith.constant 0 : i32
    %c0_i32_0 = arith.constant 0 : i32
    return %c0_i32, %arg0 : i32, i32
  }
  func.func @transform_4(%arg0: i32, %arg1: i32) -> (i32, i32, i32) {
    %c0_i32 = arith.constant 0 : i32
    %c0_i32_0 = arith.constant 0 : i32
    return %arg1, %c0_i32, %arg0 : i32, i32, i32
  }
}

module attributes {stable_mosaic.version = 11 : i64} {
  func.func @_conv3x3_s2_kernel(%arg0: i32, %arg1: i32, %arg2: memref<1x2x96xbf16, #tpu.memory_space<vmem>>, %arg3: memref<96x128xbf16, #tpu.memory_space<vmem>>, %arg4: memref<48x128xbf16, #tpu.memory_space<vmem>>, %arg5: memref<1x128xf32, #tpu.memory_space<vmem>>, %arg6: memref<1x1x128xbf16, #tpu.memory_space<vmem>>) attributes {dimension_semantics = [#tpu.dimension_semantics<parallel>, #tpu.dimension_semantics<parallel>], iteration_bounds = array<i64: 1, 2>, scalar_prefetch = 0 : i64, scratch_operands = 0 : i64, tpu.core_type = #tpu.core_type<tc>, window_params = [{transform_indices = @transform_0, window_bounds = array<i64: 1, 2, 96>}, {transform_indices = @transform_1, window_bounds = array<i64: 96, 128>}, {transform_indices = @transform_2, window_bounds = array<i64: 48, 128>}, {transform_indices = @transform_3, window_bounds = array<i64: 1, 128>}, {transform_indices = @transform_4, window_bounds = array<i64: 1, 1, 128>}]} {
    %c0 = arith.constant 0 : index
    %c0_0 = arith.constant 0 : index
    %c0_1 = arith.constant 0 : index
    %0 = vector.load %arg2[%c0, %c0_0, %c0_1] : memref<1x2x96xbf16, #tpu.memory_space<vmem>>, vector<1x1x96xbf16>
    %1 = vector.shape_cast %0 : vector<1x1x96xbf16> to vector<1x96xbf16>
    %c0_2 = arith.constant 0 : index
    %c1 = arith.constant 1 : index
    %c0_3 = arith.constant 0 : index
    %2 = vector.load %arg2[%c0_2, %c1, %c0_3] : memref<1x2x96xbf16, #tpu.memory_space<vmem>>, vector<1x1x48xbf16>
    %3 = vector.shape_cast %2 : vector<1x1x48xbf16> to vector<1x48xbf16>
    %c0_4 = arith.constant 0 : index
    %c0_5 = arith.constant 0 : index
    %4 = vector.load %arg3[%c0_4, %c0_5] : memref<96x128xbf16, #tpu.memory_space<vmem>>, vector<96x128xbf16>
    %cst = arith.constant dense<0.000000e+00> : vector<1x128xf32>
    %5 = tpu.matmul %1, %4, %cst {dimension_numbers = #tpu.dot_dimension_numbers<[1], [0], [0], [1], [0, 0, 1, 1], [], []>} : vector<1x96xbf16>, vector<96x128xbf16>, vector<1x128xf32> -> vector<1x128xf32>
    %c0_6 = arith.constant 0 : index
    %c0_7 = arith.constant 0 : index
    %6 = vector.load %arg4[%c0_6, %c0_7] : memref<48x128xbf16, #tpu.memory_space<vmem>>, vector<48x128xbf16>
    %cst_8 = arith.constant dense<0.000000e+00> : vector<1x128xf32>
    %7 = tpu.matmul %3, %6, %cst_8 {dimension_numbers = #tpu.dot_dimension_numbers<[1], [0], [0], [1], [0, 0, 1, 1], [], []>} : vector<1x48xbf16>, vector<48x128xbf16>, vector<1x128xf32> -> vector<1x128xf32>
    %8 = arith.addf %5, %7 : vector<1x128xf32>
    %c0_9 = arith.constant 0 : index
    %c0_10 = arith.constant 0 : index
    %9 = vector.load %arg5[%c0_9, %c0_10] : memref<1x128xf32, #tpu.memory_space<vmem>>, vector<1x128xf32>
    %10 = arith.addf %8, %9 : vector<1x128xf32>
    %cst_11 = arith.constant 2.000000e-01 : f32
    %11 = vector.broadcast %cst_11 : f32 to vector<1x128xf32>
    %12 = arith.mulf %11, %10 : vector<1x128xf32>
    %13 = arith.maximumf %10, %12 : vector<1x128xf32>
    %14 = arith.truncf %13 : vector<1x128xf32> to vector<1x128xbf16>
    %c0_12 = arith.constant 0 : index
    %c0_13 = arith.constant 0 : index
    %c0_14 = arith.constant 0 : index
    %15 = vector.load %arg6[%c0_12, %c0_13, %c0_14] : memref<1x1x128xbf16, #tpu.memory_space<vmem>>, vector<1x1x128xbf16>
    %16 = vector.shape_cast %15 : vector<1x1x128xbf16> to vector<1x128xbf16>
    %17 = vector.shape_cast %14 : vector<1x128xbf16> to vector<1x1x128xbf16>
    tpu.vector_store %arg6[%c0_12, %c0_13, %c0_14], %17 {strides = array<i32>} : memref<1x1x128xbf16, #tpu.memory_space<vmem>>, vector<1x1x128xbf16>,
    return
  }
  func.func @transform_0(%arg0: i32, %arg1: i32) -> (i32, i32, i32) {
    %c0_i32 = arith.constant 0 : i32
    %c0_i32_0 = arith.constant 0 : i32
    %c0_i32_1 = arith.constant 0 : i32
    return %arg1, %c0_i32, %c0_i32_0 : i32, i32, i32
  }
  func.func @transform_1(%arg0: i32, %arg1: i32) -> (i32, i32) {
    %c0_i32 = arith.constant 0 : i32
    %c0_i32_0 = arith.constant 0 : i32
    return %c0_i32, %arg0 : i32, i32
  }
  func.func @transform_2(%arg0: i32, %arg1: i32) -> (i32, i32) {
    %c0_i32 = arith.constant 0 : i32
    %c0_i32_0 = arith.constant 0 : i32
    return %c0_i32, %arg0 : i32, i32
  }
  func.func @transform_3(%arg0: i32, %arg1: i32) -> (i32, i32) {
    %c0_i32 = arith.constant 0 : i32
    %c0_i32_0 = arith.constant 0 : i32
    return %c0_i32, %arg0 : i32, i32
  }
  func.func @transform_4(%arg0: i32, %arg1: i32) -> (i32, i32, i32) {
    %c0_i32 = arith.constant 0 : i32
    %c0_i32_0 = arith.constant 0 : i32
    return %arg1, %c0_i32, %arg0 : i32, i32, i32
  }
}

module attributes {stable_mosaic.version = 11 : i64} {
  func.func @_stacked_mm_kernel(%arg0: i32, %arg1: i32, %arg2: i32, %arg3: i32, %arg4: memref<1x2x32xf32, #tpu.memory_space<vmem>>, %arg5: memref<1x32x32xf32, #tpu.memory_space<vmem>>, %arg6: memref<1x1x32xf32, #tpu.memory_space<vmem>>, %arg7: memref<1x2x32xf32, #tpu.memory_space<vmem>>, %arg8: memref<2x32xf32, #tpu.memory_space<vmem>>) attributes {dimension_semantics = [#tpu.dimension_semantics<parallel>, #tpu.dimension_semantics<parallel>, #tpu.dimension_semantics<parallel>, #tpu.dimension_semantics<arbitrary>], iteration_bounds = array<i64: 2, 1, 1, 1>, scalar_prefetch = 0 : i64, scratch_operands = 1 : i64, tpu.core_type = #tpu.core_type<tc>, window_params = [{transform_indices = @transform_0, window_bounds = array<i64: 1, 2, 32>}, {transform_indices = @transform_1, window_bounds = array<i64: 1, 32, 32>}, {transform_indices = @transform_2, window_bounds = array<i64: 1, 1, 32>}, {transform_indices = @transform_3, window_bounds = array<i64: 1, 2, 32>}]} {
    %c0_i32 = arith.constant 0 : i32
    %0 = arith.cmpi eq, %arg3, %c0_i32 : i32
    %1 = arith.extui %0 : i1 to i32
    %c0_i32_0 = arith.constant 0 : i32
    %2 = arith.cmpi ne, %1, %c0_i32_0 : i32
    scf.if %2 {
      %cst_12 = arith.constant 0.000000e+00 : f32
      %14 = vector.broadcast %cst_12 : f32 to vector<2x32xf32>
      %c0_13 = arith.constant 0 : index
      %c0_14 = arith.constant 0 : index
      %15 = vector.load %arg8[%c0_13, %c0_14] : memref<2x32xf32, #tpu.memory_space<vmem>>, vector<2x32xf32>
      tpu.vector_store %arg8[%c0_13, %c0_14], %14 {strides = array<i32>} : memref<2x32xf32, #tpu.memory_space<vmem>>, vector<2x32xf32>,
    } else {
    }
    %c0 = arith.constant 0 : index
    %c0_1 = arith.constant 0 : index
    %3 = vector.load %arg8[%c0, %c0_1] : memref<2x32xf32, #tpu.memory_space<vmem>>, vector<2x32xf32>
    %c0_2 = arith.constant 0 : index
    %c0_3 = arith.constant 0 : index
    %c0_4 = arith.constant 0 : index
    %4 = vector.load %arg4[%c0_2, %c0_3, %c0_4] : memref<1x2x32xf32, #tpu.memory_space<vmem>>, vector<1x2x32xf32>
    %5 = vector.shape_cast %4 : vector<1x2x32xf32> to vector<2x32xf32>
    %c0_5 = arith.constant 0 : index
    %c0_6 = arith.constant 0 : index
    %c0_7 = arith.constant 0 : index
    %6 = vector.load %arg5[%c0_5, %c0_6, %c0_7] : memref<1x32x32xf32, #tpu.memory_space<vmem>>, vector<1x32x32xf32>
    %7 = vector.shape_cast %6 : vector<1x32x32xf32> to vector<32x32xf32>
    %cst = arith.constant dense<0.000000e+00> : vector<2x32xf32>
    %8 = tpu.matmul %5, %7, %cst {dimension_numbers = #tpu.dot_dimension_numbers<[1], [0], [0], [1], [0, 0, 1, 1], [], []>} : vector<2x32xf32>, vector<32x32xf32>, vector<2x32xf32> -> vector<2x32xf32>
    %9 = arith.addf %3, %8 : vector<2x32xf32>
    %c0_8 = arith.constant 0 : index
    %c0_9 = arith.constant 0 : index
    %10 = vector.load %arg8[%c0_8, %c0_9] : memref<2x32xf32, #tpu.memory_space<vmem>>, vector<2x32xf32>
    tpu.vector_store %arg8[%c0_8, %c0_9], %9 {strides = array<i32>} : memref<2x32xf32, #tpu.memory_space<vmem>>, vector<2x32xf32>,
    %c0_i32_10 = arith.constant 0 : i32
    %11 = arith.cmpi eq, %arg3, %c0_i32_10 : i32
    %12 = arith.extui %11 : i1 to i32
    %c0_i32_11 = arith.constant 0 : i32
    %13 = arith.cmpi ne, %12, %c0_i32_11 : i32
    scf.if %13 {
      %c0_12 = arith.constant 0 : index
      %c0_13 = arith.constant 0 : index
      %14 = vector.load %arg8[%c0_12, %c0_13] : memref<2x32xf32, #tpu.memory_space<vmem>>, vector<2x32xf32>
      %c0_14 = arith.constant 0 : index
      %c0_15 = arith.constant 0 : index
      %c0_16 = arith.constant 0 : index
      %15 = vector.load %arg6[%c0_14, %c0_15, %c0_16] : memref<1x1x32xf32, #tpu.memory_space<vmem>>, vector<1x1x32xf32>
      %16 = vector.shape_cast %15 : vector<1x1x32xf32> to vector<1x32xf32>
      %17 = vector.broadcast %16 : vector<1x32xf32> to vector<2x32xf32>
      %18 = arith.addf %14, %17 : vector<2x32xf32>
      %c0_17 = arith.constant 0 : index
      %c0_18 = arith.constant 0 : index
      %c0_19 = arith.constant 0 : index
      %19 = vector.load %arg7[%c0_17, %c0_18, %c0_19] : memref<1x2x32xf32, #tpu.memory_space<vmem>>, vector<1x2x32xf32>
      %20 = vector.shape_cast %19 : vector<1x2x32xf32> to vector<2x32xf32>
      %21 = vector.shape_cast %18 : vector<2x32xf32> to vector<1x2x32xf32>
      tpu.vector_store %arg7[%c0_17, %c0_18, %c0_19], %21 {strides = array<i32>} : memref<1x2x32xf32, #tpu.memory_space<vmem>>, vector<1x2x32xf32>,
    } else {
    }
    return
  }
  func.func @transform_0(%arg0: i32, %arg1: i32, %arg2: i32, %arg3: i32) -> (i32, i32, i32) {
    %c0_i32 = arith.constant 0 : i32
    return %arg0, %arg1, %arg3 : i32, i32, i32
  }
  func.func @transform_1(%arg0: i32, %arg1: i32, %arg2: i32, %arg3: i32) -> (i32, i32, i32) {
    %c0_i32 = arith.constant 0 : i32
    return %arg0, %arg3, %arg2 : i32, i32, i32
  }
  func.func @transform_2(%arg0: i32, %arg1: i32, %arg2: i32, %arg3: i32) -> (i32, i32, i32) {
    %c0_i32 = arith.constant 0 : i32
    %c0_i32_0 = arith.constant 0 : i32
    return %arg0, %c0_i32, %arg2 : i32, i32, i32
  }
  func.func @transform_3(%arg0: i32, %arg1: i32, %arg2: i32, %arg3: i32) -> (i32, i32, i32) {
    %c0_i32 = arith.constant 0 : i32
    return %arg0, %arg1, %arg2 : i32, i32, i32
  }
}

</mosaic_0001>

<bundles_post_ra>
// kernel: _lambda_.9
= control target key start
LH: loop header
LB: loop body
LE: loop exit
PB: predicated region body
PF: predicated region fallthrough
CT: control target
= control target key end

     0   :  { %s1628_s15 = smov 0   ;;  %s1630_s16 = smov 0   ;;  %s1780_s0 = inlined_call_operand.vmem [shape: bf16[2,272,24], index: 0, kind: input, shape index: {}]   ;;  %s1781_s1 = inlined_call_operand.vmem [shape: bf16[24,128], index: 1, kind: input, shape index: {}]   ;;  %s1782_s2 = inlined_call_operand.vmem [shape: bf16[12,128], index: 2, kind: input, shape index: {}]   ;;  %s1783_s3 = inlined_call_operand.vmem [shape: f32[1,128], index: 3, kind: input, shape index: {}]   ;;  %s1784_s4 = inlined_call_operand.vmem [shape: bf16[2,256,128], index: 4, kind: output, shape index: {}]  }
   0x1   :  { %s1632_s17 = smov 0  }
   0x2 LB: > { %s26_s18 = sadd.s32 1, %s1597_s16  ;;  %p1208_p0 = scmp.ge.s32.totalorder %s1601_s17, 1  ;;  %s1601_s17 = sphi %s1632_s17, %s14_s17   ;;  %s1597_s16 = sphi %s1630_s16, %s1786_s16   ;;  %s1593_s15 = sphi %s1628_s15, %s1785_s15  }
   0x3   : > { %p28_p1 = scmp.ge.s32.totalorder %s26_s18, 2  ;;  %p202_p2 = scmp.lt.s32.totalorder %s1601_s17, 3 }
   0x5   : > { %s1788_s18 = smov (%p28_p1, %s26_s18), 0  ;;  %p203_p3 = pnand %p1208_p0, %p202_p2 }
   0x6   : > { %p242_p4 = scmp.lt.s32.totalorder (!%p203_p3), %s1593_s15, 1 }
   0x7   : > { %206 = sbr.rel (%p203_p3) target bundleno = 287 (0x11f), region = 36 }
   0xc   : > { %v1559_v0 = vld [vmem:[%s1781_s1 + $0x8] ss:$0 sps:$4 sm:$0xff]   ;;  %vm653_vm0 = vcmask 1043456   ;;  %vm440_vm1 = vcmask 1045504   ;;  %v1560_v1 = vld [vmem:[%s1782_s2] sm:$0x3f]  }
   0xd   : > { %1533 = vmatprep.subr.msk.bf16.mxu1 %vm653_vm0, %v1559_v0  ;;  %v655_v2 = vsel %vm653_vm0, %v1559_v0, 0  ;;  %v1561_v3 = vld [vmem:[%s1781_s1] sm:$0xff]   ;;  %1532 = vmatprep.subr.msk.bf16.mxu0 %vm440_vm1, %v1560_v1  ;;  %v442_v4 = vsel %vm440_vm1, %v1560_v1, 0  ;;  %s1790_s15 = smov (!%p242_p4, %s1593_s15), 1  ;;  %vm391_vm2 = vcmask 97280   ;;  %vm619_vm3 = vcmask 195584  }
   0xe   : > { %1497 = vmatpush3.bf16.msra.mxu1 %v655_v2  ;;  %1463 = vmatpush3.bf16.msra.mxu0 %v442_v4  ;;  %s1534_s25 = smul.u32 136, %s1790_s15  ;;  %v1715_v24 = vld [vmem:[%s1783_s3] ss:$0 sm:$0xff]  ;;  %s1299_s5 = sshll.u32 %s1790_s15, 7 }
   0xf   : > { %1498 = vmatprep.subr.bf16.mxu1 %v1561_v3  ;;  %s1725_s8 = scalar_lea.vmem %s1784_s4, %s1299_s5 }
  0x10   : > { %s1661_s28 = scalar_lea.vmem %s1780_s0, %s1534_s25 }
  0x11   : > { %v1562_v5 = vld [vmem:[%s1661_s28 + $0x8] sm:$0xff]   ;;  %v1563_v6 = vld [vmem:[%s1661_s28] sm:$0xff]   ;;  %v1564_v7 = vld [vmem:[%s1661_s28 + $0x10] sm:$0xff]  }
  0x12   : > { %1499 = vmatpush3.bf16.msra.mxu1 %v1561_v3  ;;  %1464 = vmatprep.mubr.msk.bf16.mxu0 %vm391_vm2, %v1562_v5  ;;  %v1565_v8 = vld [vmem:[%s1661_s28 + $0x18] sm:$0xff]   ;;  %v1566_v9 = vld [vmem:[%s1661_s28 + $0x20] sm:$0xff]   ;;  %v1567_v10 = vld [vmem:[%s1661_s28 + $0x28] sm:$0xff]  }
  0x13   : > { %1500 = vmatprep.mubr.msk.bf16.mxu1 %vm619_vm3, %v1563_v6  ;;  %1465 = vmatmul.mubr.msk.bf16.vlgmr.msra.gmra.mxu0 %vm391_vm2, %v1564_v7  ;;  %v1568_v11 = vld [vmem:[%s1661_s28 + $0x30] sm:$0xff]   ;;  %v1569_v12 = vld [vmem:[%s1661_s28 + $0x38] sm:$0xff]   ;;  %v1570_v13 = vld [vmem:[%s1661_s28 + $0x40] sm:$0xff]  }
  0x14   : > { %1468 = vmatprep.mubr.msk.bf16.mxu0 %vm391_vm2, %v1565_v8  ;;  %v1571_v14 = vld [vmem:[%s1661_s28 + $0x48] sm:$0xff]   ;;  %v1572_v15 = vld [vmem:[%s1661_s28 + $0x50] sm:$0xff]   ;;  %v1573_v16 = vld [vmem:[%s1661_s28 + $0x58] sm:$0xff]  }
  0x15   : > { %1501 = vmatmul.mubr.msk.bf16.vlgmr.msra.gmra.mxu1 %vm619_vm3, %v1562_v5  ;;  %v1574_v17 = vld [vmem:[%s1661_s28 + $0x60] sm:$0xff]   ;;  %v1575_v18 = vld [vmem:[%s1661_s28 + $0x68] sm:$0xff]   ;;  %v1576_v19 = vld [vmem:[%s1661_s28 + $0x70] sm:$0xff]  }
  0x16   : > { %1504 = vmatprep.mubr.msk.bf16.mxu1 %vm619_vm3, %v1564_v7  ;;  %v1577_v20 = vld [vmem:[%s1661_s28 + $0x78] sm:$0xff]   ;;  %v1578_v21 = vld [vmem:[%s1661_s28 + $0x80] sm:$0xff]  }
  0x1b   : > { %1469 = vmatmul.mubr.msk.bf16.gmra.mxu0 %vm391_vm2, %v1566_v9 }
  0x1c   : > { %1472 = vmatprep.mubr.msk.bf16.mxu0 %vm391_vm2, %v1567_v10 }
  0x1d   : > { %1505 = vmatmul.mubr.msk.bf16.gmra.mxu1 %vm619_vm3, %v1565_v8 }
  0x1e   : > { %1508 = vmatprep.mubr.msk.bf16.mxu1 %vm619_vm3, %v1566_v9 }
  0x23   : > { %1473 = vmatmul.mubr.msk.bf16.gmra.mxu0 %vm391_vm2, %v1568_v11 }
  0x24   : > { %1476 = vmatprep.mubr.msk.bf16.mxu0 %vm391_vm2, %v1569_v12 }
  0x25   : > { %1509 = vmatmul.mubr.msk.bf16.gmra.mxu1 %vm619_vm3, %v1567_v10 }
  0x26   : > { %1512 = vmatprep.mubr.msk.bf16.mxu1 %vm619_vm3, %v1568_v11 }
  0x2b   : > { %1477 = vmatmul.mubr.msk.bf16.gmra.mxu0 %vm391_vm2, %v1570_v13 }
  0x2c   : > { %1480 = vmatprep.mubr.msk.bf16.mxu0 %vm391_vm2, %v1571_v14 }
  0x2d   : > { %1513 = vmatmul.mubr.msk.bf16.gmra.mxu1 %vm619_vm3, %v1569_v12 }
  0x2e   : > { %1516 = vmatprep.mubr.msk.bf16.mxu1 %vm619_vm3, %v1570_v13 }
  0x33   : > { %1481 = vmatmul.mubr.msk.bf16.gmra.mxu0 %vm391_vm2, %v1572_v15 }
  0x34   : > { %1484 = vmatprep.mubr.msk.bf16.mxu0 %vm391_vm2, %v1573_v16 }
  0x35   : > { %1517 = vmatmul.mubr.msk.bf16.gmra.mxu1 %vm619_vm3, %v1571_v14 }
  0x36   : > { %1520 = vmatprep.mubr.msk.bf16.mxu1 %vm619_vm3, %v1572_v15 }
  0x3b   : > { %1485 = vmatmul.mubr.msk.bf16.gmra.mxu0 %vm391_vm2, %v1574_v17 }
  0x3c   : > { %1488 = vmatprep.mubr.msk.bf16.mxu0 %vm391_vm2, %v1575_v18 }
  0x3d   : > { %1521 = vmatmul.mubr.msk.bf16.gmra.mxu1 %vm619_vm3, %v1573_v16 }
  0x3e   : > { %1524 = vmatprep.mubr.msk.bf16.mxu1 %vm619_vm3, %v1574_v17 }
  0x43   : > { %1489 = vmatmul.mubr.msk.bf16.gmra.mxu0 %vm391_vm2, %v1576_v19 }
  0x44   : > { %1492 = vmatprep.mubr.msk.bf16.mxu0 %vm391_vm2, %v1577_v20 }
  0x45   : > { %1525 = vmatmul.mubr.msk.bf16.gmra.mxu1 %vm619_vm3, %v1575_v18 }
  0x46   : > { %1528 = vmatprep.mubr.msk.bf16.mxu1 %vm619_vm3, %v1576_v19 }
  0x4b   : > { %1493 = vmatmul.mubr.msk.bf16.gmra.mxu0 %vm391_vm2, %v1578_v21 }
  0x4d   : > { %1529 = vmatmul.mubr.msk.bf16.gmra.mxu1 %vm619_vm3, %v1577_v20 }
  0xd3   : > { %v1466_v22 = vpop.f32.mrf.mxu0 }
  0xd5   : > { %v1502_v23 = vpop.f32.mrf.mxu1  ;;  %v478_v26 = vpop.f32.mrf.mxu0 }
  0xd6   : > { %v700_v25 = vadd.f32 %v1502_v23, %v1466_v22 }
  0xd7   : > { %v691_v27 = vpop.f32.mrf.mxu1  ;;  %v1467_v30 = vpop.f32.mrf.mxu0 }
  0xd8   : > { %v827_v28 = vadd.f32 %v1715_v24, %v700_v25  ;;  %v692_v29 = vadd.f32 %v691_v27, %v478_v26 }
  0xd9   : > { %v1503_v31 = vpop.f32.mrf.mxu1  ;;  %v481_v34 = vpop.f32.mrf.mxu0 }
  0xda   : > { %v825_v32 = vadd.f32 %v1715_v24, %v692_v29  ;;  %v703_v33 = vadd.f32 %v1503_v31, %v1467_v30  ;;  %v859_v36 = vmul.f32 0.2, %v827_v28 }
  0xdb   : > { %v694_v35 = vpop.f32.mrf.mxu1  ;;  %v1470_v39 = vpop.f32.mrf.mxu0 }
  0xdc   : > { %v828_v37 = vadd.f32 %v1715_v24, %v703_v33  ;;  %v695_v38 = vadd.f32 %v694_v35, %v481_v34  ;;  %v857_v41 = vmul.f32 0.2, %v825_v32  ;;  %v891_v47 = vmax.f32 %v827_v28, %v859_v36 }
  0xdd   : > { %v1506_v40 = vpop.f32.mrf.mxu1  ;;  %v494_v45 = vpop.f32.mrf.mxu0 }
  0xde   : > { %v860_v42 = vmul.f32 0.2, %v828_v37  ;;  %v826_v43 = vadd.f32 %v1715_v24, %v695_v38  ;;  %v716_v44 = vadd.f32 %v1506_v40, %v1470_v39  ;;  %v889_v54 = vmax.f32 %v825_v32, %v857_v41 }
  0xdf   : > { %v707_v46 = vpop.f32.mrf.mxu1  ;;  %v1471_v52 = vpop.f32.mrf.mxu0 }
  0xe0   : > { %v892_v48 = vmax.f32 %v828_v37, %v860_v42  ;;  %v858_v49 = vmul.f32 0.2, %v826_v43  ;;  %v708_v50 = vadd.f32 %v707_v46, %v494_v45  ;;  %v831_v51 = vadd.f32 %v1715_v24, %v716_v44 }
  0xe1   : > { %v1507_v53 = vpop.f32.mrf.mxu1  ;;  %v497_v59 = vpop.f32.mrf.mxu0 }
  0xe2   : > { %v1340_v55 = vpack.c.bf16 %v892_v48, %v891_v47  ;;  %v890_v56 = vmax.f32 %v826_v43, %v858_v49  ;;  %v829_v57 = vadd.f32 %v1715_v24, %v708_v50  ;;  %v719_v58 = vadd.f32 %v1507_v53, %v1471_v52 }
  0xe3   : > { %v710_v60 = vpop.f32.mrf.mxu1  ;;  %v863_v63 = vmul.f32 0.2, %v831_v51  ;;  %v1474_v1 = vpop.f32.mrf.mxu0 }
  0xe4   : > { %1412 = vst [vmem:[%s1725_s8 + $0x8] sm:$0xff] %v1340_v55   ;;  %v1335_v61 = vpack.c.bf16 %v890_v56, %v889_v54  ;;  %v711_v62 = vadd.f32 %v710_v60, %v497_v59  ;;  %v832_v0 = vadd.f32 %v1715_v24, %v719_v58  ;;  %v861_v3 = vmul.f32 0.2, %v829_v57 }
  0xe5   : > { %v1510_v2 = vpop.f32.mrf.mxu1  ;;  %v510_v7 = vpop.f32.mrf.mxu0  ;;  %v895_v12 = vmax.f32 %v831_v51, %v863_v63 }
  0xe6   : > { %1336 = vst [vmem:[%s1725_s8] sm:$0xff] %v1335_v61   ;;  %v830_v4 = vadd.f32 %v1715_v24, %v711_v62  ;;  %v732_v5 = vadd.f32 %v1510_v2, %v1474_v1  ;;  %v864_v6 = vmul.f32 0.2, %v832_v0  ;;  %v893_v16 = vmax.f32 %v829_v57, %v861_v3 }
  0xe7   : > { %v723_v8 = vpop.f32.mrf.mxu1  ;;  %v1475_v14 = vpop.f32.mrf.mxu0 }
  0xe8   : > { %v862_v9 = vmul.f32 0.2, %v830_v4  ;;  %v835_v10 = vadd.f32 %v1715_v24, %v732_v5  ;;  %v724_v11 = vadd.f32 %v723_v8, %v510_v7  ;;  %v896_v13 = vmax.f32 %v832_v0, %v864_v6 }
  0xe9   : > { %v1511_v15 = vpop.f32.mrf.mxu1  ;;  %v513_v21 = vpop.f32.mrf.mxu0 }
  0xea   : > { %v894_v17 = vmax.f32 %v830_v4, %v862_v9  ;;  %v735_v18 = vadd.f32 %v1511_v15, %v1475_v14  ;;  %v1350_v19 = vpack.c.bf16 %v896_v13, %v895_v12  ;;  %v833_v20 = vadd.f32 %v1715_v24, %v724_v11 }
  0xeb   : > { %v726_v22 = vpop.f32.mrf.mxu1  ;;  %v867_v25 = vmul.f32 0.2, %v835_v10  ;;  %v1478_v28 = vpop.f32.mrf.mxu0 }
  0xec   : > { %v1345_v23 = vpack.c.bf16 %v894_v17, %v893_v16  ;;  %v836_v26 = vadd.f32 %v1715_v24, %v735_v18  ;;  %1414 = vst [vmem:[%s1725_s8 + $0x18] sm:$0xff] %v1350_v19   ;;  %v727_v27 = vadd.f32 %v726_v22, %v513_v21  ;;  %v865_v32 = vmul.f32 0.2, %v833_v20 }
  0xed   : > { %v1514_v29 = vpop.f32.mrf.mxu1  ;;  %v526_v34 = vpop.f32.mrf.mxu0  ;;  %v899_v36 = vmax.f32 %v835_v10, %v867_v25 }
  0xee   : > { %1413 = vst [vmem:[%s1725_s8 + $0x10] sm:$0xff] %v1345_v23   ;;  %v868_v30 = vmul.f32 0.2, %v836_v26  ;;  %v748_v31 = vadd.f32 %v1514_v29, %v1478_v28  ;;  %v834_v33 = vadd.f32 %v1715_v24, %v727_v27  ;;  %v897_v46 = vmax.f32 %v833_v20, %v865_v32 }
  0xef   : > { %v739_v35 = vpop.f32.mrf.mxu1  ;;  %v1479_v41 = vpop.f32.mrf.mxu0 }
  0xf0   : > { %v900_v37 = vmax.f32 %v836_v26, %v868_v30  ;;  %v839_v38 = vadd.f32 %v1715_v24, %v748_v31  ;;  %v740_v39 = vadd.f32 %v739_v35, %v526_v34  ;;  %v866_v40 = vmul.f32 0.2, %v834_v33 }
  0xf1   : > { %v1515_v42 = vpop.f32.mrf.mxu1  ;;  %v529_v48 = vpop.f32.mrf.mxu0 }
  0xf2   : > { %v1360_v43 = vpack.c.bf16 %v900_v37, %v899_v36  ;;  %v837_v44 = vadd.f32 %v1715_v24, %v740_v39  ;;  %v751_v45 = vadd.f32 %v1515_v42, %v1479_v41  ;;  %v898_v47 = vmax.f32 %v834_v33, %v866_v40 }
  0xf3   : > { %v742_v49 = vpop.f32.mrf.mxu1  ;;  %v871_v50 = vmul.f32 0.2, %v839_v38  ;;  %v1482_v54 = vpop.f32.mrf.mxu0 }
  0xf4   : > { %1416 = vst [vmem:[%s1725_s8 + $0x28] sm:$0xff] %v1360_v43   ;;  %v840_v51 = vadd.f32 %v1715_v24, %v751_v45  ;;  %v743_v52 = vadd.f32 %v742_v49, %v529_v48  ;;  %v1355_v53 = vpack.c.bf16 %v898_v47, %v897_v46  ;;  %v869_v56 = vmul.f32 0.2, %v837_v44 }
  0xf5   : > { %v1518_v55 = vpop.f32.mrf.mxu1  ;;  %v542_v60 = vpop.f32.mrf.mxu0  ;;  %v903_v62 = vmax.f32 %v839_v38, %v871_v50 }
  0xf6   : > { %v872_v57 = vmul.f32 0.2, %v840_v51  ;;  %v838_v58 = vadd.f32 %v1715_v24, %v743_v52  ;;  %v764_v59 = vadd.f32 %v1518_v55, %v1482_v54  ;;  %1415 = vst [vmem:[%s1725_s8 + $0x20] sm:$0xff] %v1355_v53   ;;  %v901_v5 = vmax.f32 %v837_v44, %v869_v56 }
  0xf7   : > { %v755_v61 = vpop.f32.mrf.mxu1  ;;  %v1483_v3 = vpop.f32.mrf.mxu0 }
  0xf8   : > { %v904_v63 = vmax.f32 %v840_v51, %v872_v57  ;;  %v870_v0 = vmul.f32 0.2, %v838_v58  ;;  %v756_v1 = vadd.f32 %v755_v61, %v542_v60  ;;  %v843_v2 = vadd.f32 %v1715_v24, %v764_v59 }
  0xf9   : > { %v1519_v4 = vpop.f32.mrf.mxu1  ;;  %v545_v10 = vpop.f32.mrf.mxu0 }
  0xfa   : > { %v1370_v6 = vpack.c.bf16 %v904_v63, %v903_v62  ;;  %v902_v7 = vmax.f32 %v838_v58, %v870_v0  ;;  %v841_v8 = vadd.f32 %v1715_v24, %v756_v1  ;;  %v767_v9 = vadd.f32 %v1519_v4, %v1483_v3 }
  0xfb   : > { %v758_v11 = vpop.f32.mrf.mxu1  ;;  %v875_v14 = vmul.f32 0.2, %v843_v2  ;;  %v1486_v16 = vpop.f32.mrf.mxu0 }
  0xfc   : > { %1418 = vst [vmem:[%s1725_s8 + $0x38] sm:$0xff] %v1370_v6   ;;  %v1365_v12 = vpack.c.bf16 %v902_v7, %v901_v5  ;;  %v759_v13 = vadd.f32 %v758_v11, %v545_v10  ;;  %v844_v15 = vadd.f32 %v1715_v24, %v767_v9  ;;  %v873_v18 = vmul.f32 0.2, %v841_v8 }
  0xfd   : > { %v1522_v17 = vpop.f32.mrf.mxu1  ;;  %v558_v22 = vpop.f32.mrf.mxu0  ;;  %v907_v28 = vmax.f32 %v843_v2, %v875_v14 }
  0xfe   : > { %1417 = vst [vmem:[%s1725_s8 + $0x30] sm:$0xff] %v1365_v12   ;;  %v842_v19 = vadd.f32 %v1715_v24, %v759_v13  ;;  %v780_v20 = vadd.f32 %v1522_v17, %v1486_v16  ;;  %v876_v21 = vmul.f32 0.2, %v844_v15  ;;  %v905_v32 = vmax.f32 %v841_v8, %v873_v18 }
  0xff   : > { %v771_v23 = vpop.f32.mrf.mxu1  ;;  %v1487_v30 = vpop.f32.mrf.mxu0 }
 0x100   : > { %v874_v25 = vmul.f32 0.2, %v842_v19  ;;  %v847_v26 = vadd.f32 %v1715_v24, %v780_v20  ;;  %v772_v27 = vadd.f32 %v771_v23, %v558_v22  ;;  %v908_v29 = vmax.f32 %v844_v15, %v876_v21 }
 0x101   : > { %v1523_v31 = vpop.f32.mrf.mxu1  ;;  %v561_v37 = vpop.f32.mrf.mxu0 }
 0x102   : > { %v906_v33 = vmax.f32 %v842_v19, %v874_v25  ;;  %v783_v34 = vadd.f32 %v1523_v31, %v1487_v30  ;;  %v1380_v35 = vpack.c.bf16 %v908_v29, %v907_v28  ;;  %v845_v36 = vadd.f32 %v1715_v24, %v772_v27 }
 0x103   : > { %v774_v38 = vpop.f32.mrf.mxu1  ;;  %v879_v40 = vmul.f32 0.2, %v847_v26  ;;  %v1490_v43 = vpop.f32.mrf.mxu0 }
 0x104   : > { %v1375_v39 = vpack.c.bf16 %v906_v33, %v905_v32  ;;  %v848_v41 = vadd.f32 %v1715_v24, %v783_v34  ;;  %1420 = vst [vmem:[%s1725_s8 + $0x48] sm:$0xff] %v1380_v35   ;;  %v775_v42 = vadd.f32 %v774_v38, %v561_v37  ;;  %v877_v47 = vmul.f32 0.2, %v845_v36 }
 0x105   : > { %v1526_v44 = vpop.f32.mrf.mxu1  ;;  %v574_v49 = vpop.f32.mrf.mxu0  ;;  %v911_v51 = vmax.f32 %v847_v26, %v879_v40 }
 0x106   : > { %1419 = vst [vmem:[%s1725_s8 + $0x40] sm:$0xff] %v1375_v39   ;;  %v880_v45 = vmul.f32 0.2, %v848_v41  ;;  %v796_v46 = vadd.f32 %v1526_v44, %v1490_v43  ;;  %v846_v48 = vadd.f32 %v1715_v24, %v775_v42  ;;  %v909_v61 = vmax.f32 %v845_v36, %v877_v47 }
 0x107   : > { %v787_v50 = vpop.f32.mrf.mxu1  ;;  %v1491_v56 = vpop.f32.mrf.mxu0 }
 0x108   : > { %v912_v52 = vmax.f32 %v848_v41, %v880_v45  ;;  %v851_v53 = vadd.f32 %v1715_v24, %v796_v46  ;;  %v788_v54 = vadd.f32 %v787_v50, %v574_v49  ;;  %v878_v55 = vmul.f32 0.2, %v846_v48 }
 0x109   : > { %v1527_v57 = vpop.f32.mrf.mxu1  ;;  %v577_v63 = vpop.f32.mrf.mxu0 }
 0x10a   : > { %v1390_v58 = vpack.c.bf16 %v912_v52, %v911_v51  ;;  %v849_v59 = vadd.f32 %v1715_v24, %v788_v54  ;;  %v799_v60 = vadd.f32 %v1527_v57, %v1491_v56  ;;  %v910_v62 = vmax.f32 %v846_v48, %v878_v55 }
 0x10b   : > { %v790_v0 = vpop.f32.mrf.mxu1  ;;  %v883_v1 = vmul.f32 0.2, %v851_v53  ;;  %v1494_v5 = vpop.f32.mrf.mxu0 }
 0x10c   : > { %1422 = vst [vmem:[%s1725_s8 + $0x58] sm:$0xff] %v1390_v58   ;;  %v852_v2 = vadd.f32 %v1715_v24, %v799_v60  ;;  %v791_v3 = vadd.f32 %v790_v0, %v577_v63  ;;  %v1385_v4 = vpack.c.bf16 %v910_v62, %v909_v61  ;;  %v881_v7 = vmul.f32 0.2, %v849_v59 }
 0x10d   : > { %v1530_v6 = vpop.f32.mrf.mxu1  ;;  %v590_v11 = vpop.f32.mrf.mxu0  ;;  %v915_v13 = vmax.f32 %v851_v53, %v883_v1 }
 0x10e   : > { %v884_v8 = vmul.f32 0.2, %v852_v2  ;;  %v850_v9 = vadd.f32 %v1715_v24, %v791_v3  ;;  %v812_v10 = vadd.f32 %v1530_v6, %v1494_v5  ;;  %1421 = vst [vmem:[%s1725_s8 + $0x50] sm:$0xff] %v1385_v4   ;;  %v913_v20 = vmax.f32 %v849_v59, %v881_v7 }
 0x10f   : > { %v803_v12 = vpop.f32.mrf.mxu1  ;;  %v1495_v18 = vpop.f32.mrf.mxu0 }
 0x110   : > { %v916_v14 = vmax.f32 %v852_v2, %v884_v8  ;;  %v882_v15 = vmul.f32 0.2, %v850_v9  ;;  %v804_v16 = vadd.f32 %v803_v12, %v590_v11  ;;  %v855_v17 = vadd.f32 %v1715_v24, %v812_v10 }
 0x111   : > { %v1531_v19 = vpop.f32.mrf.mxu1  ;;  %v593_v26 = vpop.f32.mrf.mxu0 }
 0x112   : > { %v1400_v21 = vpack.c.bf16 %v916_v14, %v915_v13  ;;  %v914_v22 = vmax.f32 %v850_v9, %v882_v15  ;;  %v853_v23 = vadd.f32 %v1715_v24, %v804_v16  ;;  %v815_v25 = vadd.f32 %v1531_v19, %v1495_v18 }
 0x113   : > { %v806_v27 = vpop.f32.mrf.mxu1  ;;  %v887_v30 = vmul.f32 0.2, %v855_v17 }
 0x114   : > { %1424 = vst [vmem:[%s1725_s8 + $0x68] sm:$0xff] %v1400_v21   ;;  %v1395_v28 = vpack.c.bf16 %v914_v22, %v913_v20  ;;  %v807_v29 = vadd.f32 %v806_v27, %v593_v26  ;;  %v856_v31 = vadd.f32 %v1715_v24, %v815_v25  ;;  %v885_v32 = vmul.f32 0.2, %v853_v23 }
 0x115   : > { %v919_v36 = vmax.f32 %v855_v17, %v887_v30 }
 0x116   : > { %1423 = vst [vmem:[%s1725_s8 + $0x60] sm:$0xff] %v1395_v28   ;;  %v854_v33 = vadd.f32 %v1715_v24, %v807_v29  ;;  %v888_v34 = vmul.f32 0.2, %v856_v31  ;;  %v917_v38 = vmax.f32 %v853_v23, %v885_v32 }
 0x118   : > { %v886_v35 = vmul.f32 0.2, %v854_v33  ;;  %v920_v37 = vmax.f32 %v856_v31, %v888_v34 }
 0x11a   : > { %v918_v39 = vmax.f32 %v854_v33, %v886_v35  ;;  %v1410_v40 = vpack.c.bf16 %v920_v37, %v919_v36 }
 0x11c   : > { %v1405_v41 = vpack.c.bf16 %v918_v39, %v917_v38  ;;  %1426 = vst [vmem:[%s1725_s8 + $0x78] sm:$0xff] %v1410_v40  }
 0x11e   : > { %1425 = vst [vmem:[%s1725_s8 + $0x70] sm:$0xff] %v1405_v41  }
 0x11f PF: > { %s14_s17 = sadd.s32 1, %s1601_s17   ;;  %s1785_s15 = smov %s1597_s16 }
 0x120   : > { %p11_p5 = scmp.ge.s32.totalorder %s14_s17, 4   ;;  %s1786_s16 = smov %s1788_s18 }
 0x122   :  { %13 = sbr.rel (!%p11_p5) target bundleno = 2 (0x2), region = 75 }

// kernel: _lambda_.10
= control target key start
LH: loop header
LB: loop body
LE: loop exit
PB: predicated region body
PF: predicated region fallthrough
CT: control target
= control target key end

     0   :  { %s869_s15 = smov 0   ;;  %s871_s16 = smov 0   ;;  %s926_s0 = inlined_call_operand.vmem [shape: bf16[2,72,24], index: 0, kind: input, shape index: {}]   ;;  %s927_s1 = inlined_call_operand.vmem [shape: bf16[24,128], index: 1, kind: input, shape index: {}]   ;;  %s928_s2 = inlined_call_operand.vmem [shape: bf16[12,128], index: 2, kind: input, shape index: {}]   ;;  %s929_s3 = inlined_call_operand.vmem [shape: f32[1,128], index: 3, kind: input, shape index: {}]   ;;  %s930_s4 = inlined_call_operand.vmem [shape: bf16[2,64,128], index: 4, kind: output, shape index: {}]  }
   0x1   :  { %s873_s17 = smov 0  }
   0x2 LB: > { %s23_s18 = sadd.s32 1, %s838_s16  ;;  %p683_p0 = scmp.ge.s32.totalorder %s842_s17, 1  ;;  %s842_s17 = sphi %s873_s17, %s14_s17   ;;  %s838_s16 = sphi %s871_s16, %s932_s16   ;;  %s834_s15 = sphi %s869_s15, %s931_s15  }
   0x3   : > { %p24_p1 = scmp.ge.s32.totalorder %s23_s18, 2  ;;  %p202_p2 = scmp.lt.s32.totalorder %s842_s17, 3 }
   0x5   : > { %s934_s18 = smov (%p24_p1, %s23_s18), 0  ;;  %p203_p3 = pnand %p683_p0, %p202_p2 }
   0x6   : > { %p242_p4 = scmp.lt.s32.totalorder (!%p203_p3), %s834_s15, 1 }
   0x7   : > { %206 = sbr.rel (%p203_p3) target bundleno = 240 (0xf0), region = 36 }
   0xc   : > { %v809_v0 = vld [vmem:[%s927_s1 + $0x8] ss:$0 sps:$4 sm:$0xff]   ;;  %vm416_vm0 = vcmask 1043456   ;;  %vm319_vm1 = vcmask 1045504   ;;  %v810_v1 = vld [vmem:[%s928_s2] sm:$0x3f]  }
   0xd   : > { %783 = vmatprep.subr.msk.bf16.mxu1 %vm416_vm0, %v809_v0  ;;  %v418_v2 = vsel %vm416_vm0, %v809_v0, 0  ;;  %v811_v3 = vld [vmem:[%s927_s1] sm:$0xff]   ;;  %782 = vmatprep.subr.msk.bf16.mxu0 %vm319_vm1, %v810_v1  ;;  %v321_v4 = vsel %vm319_vm1, %v810_v1, 0  ;;  %s936_s15 = smov (!%p242_p4, %s834_s15), 1  ;;  %vm306_vm2 = vcmask 97280   ;;  %vm403_vm3 = vcmask 195584  }
   0xe   : > { %771 = vmatpush3.bf16.msra.mxu1 %v418_v2  ;;  %761 = vmatpush3.bf16.msra.mxu0 %v321_v4  ;;  %s784_s25 = smul.u32 36, %s936_s15  ;;  %v706_v24 = vld [vmem:[%s929_s3] ss:$0 sm:$0xff]  ;;  %s717_s5 = sshll.u32 %s936_s15, 5 }
   0xf   : > { %772 = vmatprep.subr.bf16.mxu1 %v811_v3  ;;  %s265_s8 = scalar_lea.vmem %s930_s4, %s717_s5 }
  0x10   : > { %s246_s28 = scalar_lea.vmem %s926_s0, %s784_s25 }
  0x11   : > { %v268_v5 = vld [vmem:[%s246_s28 + $0x4] sm:$0xf]  ;;  %v269_v6 = vld [vmem:[%s246_s28 + $0x8] sm:$0xf]  ;;  %v270_v7 = vld [vmem:[%s246_s28 + $0xc] sm:$0xf] }
  0x12   : > { %773 = vmatpush3.bf16.msra.mxu1 %v811_v3  ;;  %v271_v8 = vld [vmem:[%s246_s28 + $0x10] sm:$0xf]  ;;  %v687_v9 = vcombine.low %v268_v5, %v269_v6  ;;  %v697_v10 = vcombine.low %v269_v6, %v270_v7  ;;  %v267_v11 = vld [vmem:[%s246_s28] sm:$0xf]  ;;  %v272_v12 = vld [vmem:[%s246_s28 + $0x14] sm:$0xf] }
  0x13   : > { %v688_v13 = vcombine.low %v270_v7, %v271_v8  ;;  %v696_v14 = vcombine.low %v267_v11, %v268_v5  ;;  %v273_v15 = vld [vmem:[%s246_s28 + $0x18] sm:$0xf]  ;;  %v698_v16 = vcombine.low %v271_v8, %v272_v12  ;;  %v274_v18 = vld [vmem:[%s246_s28 + $0x1c] sm:$0xf]  ;;  %v275_v19 = vld [vmem:[%s246_s28 + $0x20] sm:$0xf] }
  0x14   : > { %762 = vmatprep.mubr.msk.bf16.mxu0 %vm306_vm2, %v687_v9  ;;  %v689_v17 = vcombine.low %v272_v12, %v273_v15  ;;  %v690_v20 = vcombine.low %v274_v18, %v275_v19  ;;  %v699_v21 = vcombine.low %v273_v15, %v274_v18 }
  0x15   : > { %774 = vmatprep.mubr.msk.bf16.mxu1 %vm403_vm3, %v696_v14  ;;  %763 = vmatmul.mubr.msk.bf16.vlgmr.msra.gmra.mxu0 %vm306_vm2, %v688_v13 }
  0x16   : > { %775 = vmatmul.mubr.msk.bf16.vlgmr.msra.gmra.mxu1 %vm403_vm3, %v697_v10  ;;  %766 = vmatprep.mubr.msk.bf16.mxu0 %vm306_vm2, %v689_v17 }
  0x17   : > { %778 = vmatprep.mubr.msk.bf16.mxu1 %vm403_vm3, %v698_v16 }
  0x1d   : > { %767 = vmatmul.mubr.msk.bf16.gmra.mxu0 %vm306_vm2, %v690_v20 }
  0x1e   : > { %779 = vmatmul.mubr.msk.bf16.gmra.mxu1 %vm403_vm3, %v699_v21 }
  0xd5   : > { %v764_v22 = vpop.f32.mrf.mxu0 }
  0xd6   : > { %v776_v23 = vpop.f32.mrf.mxu1 }
  0xd7   : > { %v463_v25 = vadd.f32 %v776_v23, %v764_v22  ;;  %v357_v26 = vpop.f32.mrf.mxu0 }
  0xd8   : > { %v454_v27 = vpop.f32.mrf.mxu1 }
  0xd9   : > { %v494_v28 = vadd.f32 %v706_v24, %v463_v25  ;;  %v455_v29 = vadd.f32 %v454_v27, %v357_v26  ;;  %v765_v30 = vpop.f32.mrf.mxu0 }
  0xda   : > { %v777_v31 = vpop.f32.mrf.mxu1 }
  0xdb   : > { %v492_v32 = vadd.f32 %v706_v24, %v455_v29  ;;  %v466_v33 = vadd.f32 %v777_v31, %v765_v30  ;;  %v360_v34 = vpop.f32.mrf.mxu0  ;;  %v502_v36 = vmul.f32 0.2, %v494_v28 }
  0xdc   : > { %v457_v35 = vpop.f32.mrf.mxu1 }
  0xdd   : > { %v495_v37 = vadd.f32 %v706_v24, %v466_v33  ;;  %v458_v38 = vadd.f32 %v457_v35, %v360_v34  ;;  %v768_v39 = vpop.f32.mrf.mxu0  ;;  %v500_v41 = vmul.f32 0.2, %v492_v32  ;;  %v510_v47 = vmax.f32 %v494_v28, %v502_v36 }
  0xde   : > { %v780_v40 = vpop.f32.mrf.mxu1 }
  0xdf   : > { %v503_v42 = vmul.f32 0.2, %v495_v37  ;;  %v493_v43 = vadd.f32 %v706_v24, %v458_v38  ;;  %v479_v44 = vadd.f32 %v780_v40, %v768_v39  ;;  %v373_v45 = vpop.f32.mrf.mxu0  ;;  %v508_v54 = vmax.f32 %v492_v32, %v500_v41 }
  0xe0   : > { %v470_v46 = vpop.f32.mrf.mxu1 }
  0xe1   : > { %v511_v48 = vmax.f32 %v495_v37, %v503_v42  ;;  %v501_v49 = vmul.f32 0.2, %v493_v43  ;;  %v471_v50 = vadd.f32 %v470_v46, %v373_v45  ;;  %v769_v51 = vpop.f32.mrf.mxu0  ;;  %v498_v52 = vadd.f32 %v706_v24, %v479_v44 }
  0xe2   : > { %v781_v53 = vpop.f32.mrf.mxu1 }
  0xe3   : > { %v734_v55 = vpack.c.bf16 %v511_v48, %v510_v47  ;;  %v509_v56 = vmax.f32 %v493_v43, %v501_v49  ;;  %v496_v57 = vadd.f32 %v706_v24, %v471_v50  ;;  %v376_v58 = vpop.f32.mrf.mxu0  ;;  %v482_v59 = vadd.f32 %v781_v53, %v769_v51 }
  0xe4   : > { %v473_v60 = vpop.f32.mrf.mxu1  ;;  %v506_v63 = vmul.f32 0.2, %v498_v52 }
  0xe5   : > { %746 = vst [vmem:[%s265_s8 + $0x8] sm:$0xff] %v734_v55   ;;  %v729_v61 = vpack.c.bf16 %v509_v56, %v508_v54  ;;  %v474_v62 = vadd.f32 %v473_v60, %v376_v58  ;;  %v499_v0 = vadd.f32 %v706_v24, %v482_v59  ;;  %v504_v1 = vmul.f32 0.2, %v496_v57 }
  0xe6   : > { %v514_v5 = vmax.f32 %v498_v52, %v506_v63 }
  0xe7   : > { %730 = vst [vmem:[%s265_s8] sm:$0xff] %v729_v61   ;;  %v497_v2 = vadd.f32 %v706_v24, %v474_v62  ;;  %v507_v3 = vmul.f32 0.2, %v499_v0  ;;  %v512_v7 = vmax.f32 %v496_v57, %v504_v1 }
  0xe9   : > { %v505_v4 = vmul.f32 0.2, %v497_v2  ;;  %v515_v6 = vmax.f32 %v499_v0, %v507_v3 }
  0xeb   : > { %v513_v8 = vmax.f32 %v497_v2, %v505_v4  ;;  %v744_v9 = vpack.c.bf16 %v515_v6, %v514_v5 }
  0xed   : > { %v739_v10 = vpack.c.bf16 %v513_v8, %v512_v7  ;;  %748 = vst [vmem:[%s265_s8 + $0x18] sm:$0xff] %v744_v9  }
  0xef   : > { %747 = vst [vmem:[%s265_s8 + $0x10] sm:$0xff] %v739_v10  }
  0xf0 PF: > { %s14_s17 = sadd.s32 1, %s842_s17   ;;  %s931_s15 = smov %s838_s16 }
  0xf1   : > { %p11_p5 = scmp.ge.s32.totalorder %s14_s17, 4   ;;  %s932_s16 = smov %s934_s18 }
  0xf3   :  { %13 = sbr.rel (!%p11_p5) target bundleno = 2 (0x2), region = 75 }

// kernel: _lambda_.14
= control target key start
LH: loop header
LB: loop body
LE: loop exit
PB: predicated region body
PF: predicated region fallthrough
CT: control target
= control target key end

     0   :  { %s681_s15 = smov 0   ;;  %s683_s16 = smov 0   ;;  %s732_s0 = inlined_call_operand.vmem [shape: bf16[2,20,24], index: 0, kind: input, shape index: {}]   ;;  %s733_s1 = inlined_call_operand.vmem [shape: bf16[24,128], index: 1, kind: input, shape index: {}]   ;;  %s734_s2 = inlined_call_operand.vmem [shape: bf16[12,128], index: 2, kind: input, shape index: {}]   ;;  %s735_s3 = inlined_call_operand.vmem [shape: f32[1,128], index: 3, kind: input, shape index: {}]   ;;  %s736_s4 = inlined_call_operand.vmem [shape: bf16[2,16,128], index: 4, kind: output, shape index: {}]  }
   0x1   :  { %s685_s17 = smov 0  }
   0x2 LB: > { %s23_s18 = sadd.s32 1, %s648_s16  ;;  %p553_p0 = scmp.ge.s32.totalorder %s652_s17, 1  ;;  %s652_s17 = sphi %s685_s17, %s14_s17   ;;  %s648_s16 = sphi %s683_s16, %s738_s16   ;;  %s644_s15 = sphi %s681_s15, %s737_s15  }
   0x3   : > { %p24_p1 = scmp.ge.s32.totalorder %s23_s18, 2  ;;  %p202_p2 = scmp.lt.s32.totalorder %s652_s17, 3 }
   0x5   : > { %s740_s18 = smov (%p24_p1, %s23_s18), 0  ;;  %p203_p3 = pnand %p553_p0, %p202_p2 }
   0x6   : > { %p242_p4 = scmp.lt.s32.totalorder (!%p203_p3), %s644_s15, 1 }
   0x7   : > { %206 = sbr.rel (%p203_p3) target bundleno = 232 (0xe8), region = 36 }
   0xc   : > { %v624_v0 = vld [vmem:[%s733_s1 + $0x8] ss:$0 sps:$4 sm:$0xff]   ;;  %vm358_vm0 = vcmask 1043456   ;;  %v654_v1 = vmov 0.0   ;;  %vm284_vm1 = vcmask 1045504   ;;  %v625_v3 = vld [vmem:[%s733_s1] sm:$0xff]  }
   0xd   : > { %589 = vmatprep.subr.bf16.mxu1 %v654_v1  ;;  %583 = vmatprep.subr.bf16.mxu0 %v654_v1  ;;  %v360_v2 = vsel %vm358_vm0, %v624_v0, 0  ;;  %v626_v4 = vld [vmem:[%s734_s2] sm:$0x3f]   ;;  %vm655_vm2 = vmmov 0   ;;  %s742_s15 = smov (!%p242_p4, %s644_s15), 1  ;;  %vm354_vm3 = vcmask 195584  }
   0xe   : > { %590 = vmatpush3.bf16.msra.mxu1 %v360_v2  ;;  %593 = vmatprep.mubr.msk.bf16.mxu1 %vm655_vm2, %v654_v1  ;;  %v299_v5 = vsel %vm284_vm1, %v626_v4, 0  ;;  %s597_s25 = smul.u32 12, %s742_s15  ;;  %vm293_vm4 = vcmask 97280   ;;  %v565_v18 = vld [vmem:[%s735_s3] ss:$0 sm:$0xff]  ;;  %s570_s5 = sshll.u32 %s742_s15, 3 }
   0xf   : > { %591 = vmatprep.subr.bf16.mxu1 %v654_v1  ;;  %585 = vmatprep.mubr.msk.bf16.mxu0 %vm655_vm2, %v654_v1  ;;  %s265_s8 = scalar_lea.vmem %s736_s4, %s570_s5 }
  0x10   : > { %584 = vmatpush3.bf16.msra.mxu0 %v299_v5  ;;  %s246_s28 = scalar_lea.vmem %s732_s0, %s597_s25 }
  0x11   : > { %v267_v6 = vld [vmem:[%s246_s28] sm:$0xf]  ;;  %v268_v7 = vld [vmem:[%s246_s28 + $0x4] sm:$0xf] }
  0x12   : > { %592 = vmatpush3.bf16.msra.mxu1 %v625_v3  ;;  %v269_v8 = vld [vmem:[%s246_s28] sm:$0xc]  ;;  %v561_v9 = vcombine.low %v267_v6, %v268_v7  ;;  %v629_v11 = vld [vmem:[%s246_s28 + $0x8] ss:$0 sps:$4 sm:$0x33]  }
  0x13   : > { %v557_v10 = vcombine.low %v269_v8, %v268_v7  ;;  %v286_v13 = vrot.slane %v629_v11, 2 }
  0x15   : > { %594 = vmatmul.mubr.msk.bf16.vlgmr.msra.gmra.mxu1 %vm354_vm3, %v561_v9  ;;  %v285_v12 = vrot.slane %v557_v10, 2 }
  0x17   : > { %v287_v14 = vsel %vm284_vm1, %v285_v12, %v286_v13 }
  0x18   : > { %586 = vmatmul.mubr.msk.bf16.vlgmr.msra.gmra.mxu0 %vm293_vm4, %v287_v14 }
  0xd5   : > { %v396_v15 = vpop.f32.mrf.mxu1 }
  0xd7   : > { %v595_v16 = vpop.f32.mrf.mxu1 }
  0xd8   : > { %v335_v17 = vpop.f32.mrf.mxu0 }
  0xd9   : > { %v397_v19 = vadd.f32 %v396_v15, %v335_v17  ;;  %v399_v20 = vpop.f32.mrf.mxu1 }
  0xda   : > { %v587_v21 = vpop.f32.mrf.mxu0 }
  0xdb   : > { %v410_v22 = vadd.f32 %v565_v18, %v397_v19  ;;  %v596_v23 = vpop.f32.mrf.mxu1 }
  0xdc   : > { %v338_v24 = vpop.f32.mrf.mxu0 }
  0xdd   : > { %v400_v25 = vadd.f32 %v399_v20, %v338_v24  ;;  %v412_v27 = vmul.f32 0.2, %v410_v22 }
  0xde   : > { %v588_v26 = vpop.f32.mrf.mxu0 }
  0xdf   : > { %v411_v28 = vadd.f32 %v565_v18, %v400_v25  ;;  %v414_v30 = vmax.f32 %v410_v22, %v412_v27 }
  0xe1   : > { %v413_v29 = vmul.f32 0.2, %v411_v28 }
  0xe3   : > { %v415_v31 = vmax.f32 %v411_v28, %v413_v29 }
  0xe5   : > { %v576_v32 = vpack.c.bf16 %v415_v31, %v414_v30 }
  0xe7   : > { %577 = vst [vmem:[%s265_s8] sm:$0xff] %v576_v32  }
  0xe8 PF: > { %s14_s17 = sadd.s32 1, %s652_s17   ;;  %s737_s15 = smov %s648_s16 }
  0xe9   : > { %p11_p5 = scmp.ge.s32.totalorder %s14_s17, 4   ;;  %s738_s16 = smov %s740_s18 }
  0xeb   :  { %13 = sbr.rel (!%p11_p5) target bundleno = 2 (0x2), region = 75 }

// kernel: _lambda_.15
= control target key start
LH: loop header
LB: loop body
LE: loop exit
PB: predicated region body
PF: predicated region fallthrough
CT: control target
= control target key end

     0   :  { %s651_s15 = smov 0   ;;  %s653_s16 = smov 0   ;;  %s706_s0 = inlined_call_operand.vmem [shape: bf16[2,6,48], index: 0, kind: input, shape index: {}]   ;;  %s707_s1 = inlined_call_operand.vmem [shape: bf16[48,128], index: 1, kind: input, shape index: {}]   ;;  %s708_s2 = inlined_call_operand.vmem [shape: bf16[24,128], index: 2, kind: input, shape index: {}]   ;;  %s709_s3 = inlined_call_operand.vmem [shape: f32[1,128], index: 3, kind: input, shape index: {}]   ;;  %s710_s4 = inlined_call_operand.vmem [shape: bf16[2,4,128], index: 4, kind: output, shape index: {}]  }
   0x1   :  { %s655_s17 = smov 0  }
   0x2 LB: > { %s23_s18 = sadd.s32 1, %s618_s16  ;;  %p529_p0 = scmp.ge.s32.totalorder %s622_s17, 1  ;;  %s622_s17 = sphi %s655_s17, %s14_s17   ;;  %s618_s16 = sphi %s653_s16, %s712_s16   ;;  %s614_s15 = sphi %s651_s15, %s711_s15  }
   0x3   : > { %p24_p1 = scmp.ge.s32.totalorder %s23_s18, 2  ;;  %p201_p2 = scmp.lt.s32.totalorder %s622_s17, 3 }
   0x5   : > { %s714_s18 = smov (%p24_p1, %s23_s18), 0  ;;  %p202_p3 = pnand %p529_p0, %p201_p2 }
   0x6   : > { %p239_p4 = scmp.lt.s32.totalorder (!%p202_p3), %s614_s15, 1 }
   0x7   : > { %205 = sbr.rel (%p202_p3) target bundleno = 229 (0xe5), region = 36 }
   0xc   : > { %v594_v0 = vld [vmem:[%s707_s1 + $0x10] sm:$0xff]   ;;  %v624_v1 = vmov 0.0   ;;  %v595_v2 = vld [vmem:[%s708_s2 + $0x8] ss:$0 sps:$4 sm:$0xff]   ;;  %vm290_vm0 = vcmask 1043456   ;;  %v597_v5 = vld [vmem:[%s708_s2] sm:$0xff]  }
   0xd   : > { %558 = vmatprep.subr.bf16.mxu1 %v624_v1  ;;  %550 = vmatprep.subr.bf16.mxu0 %v624_v1  ;;  %v596_v3 = vld [vmem:[%s707_s1 + $0x8] sm:$0xff]   ;;  %v292_v4 = vsel %vm290_vm0, %v595_v2, 0  ;;  %vm625_vm1 = vmmov 0   ;;  %s716_s15 = smov (!%p239_p4, %s614_s15), 1  ;;  %v599_v6 = vld [vmem:[%s707_s1] sm:$0xff]   ;;  %vm286_vm2 = vcmask 195584  }
   0xe   : > { %559 = vmatpush3.bf16.msra.mxu1 %v594_v0  ;;  %551 = vmatpush3.bf16.msra.mxu0 %v292_v4  ;;  %s530_s29 = sshll.u32 %s716_s15, 2  ;;  %vm352_vm3 = vcmask 392192   ;;  %v540_v12 = vld [vmem:[%s709_s3] ss:$0 sm:$0xff]  ;;  %s531_s9 = sshll.u32 %s716_s15, 1 }
   0xf   : > { %560 = vmatprep.subr.bf16.mxu1 %v624_v1  ;;  %554 = vmatprep.mubr.msk.bf16.mxu0 %vm625_vm1, %v624_v1  ;;  %s242_s6 = scalar_lea.vmem %s706_s0, %s530_s29  ;;  %s260_s12 = scalar_lea.vmem %s710_s4, %s531_s9 }
  0x10   : > { %552 = vmatprep.subr.bf16.mxu0 %v624_v1  ;;  %564 = vmatprep.mubr.msk.bf16.mxu1 %vm625_vm1, %v624_v1  ;;  %v598_v7 = vld [vmem:[%s242_s6] ss:$0 sps:$4 sm:$0x66]  }
  0x11   : > { %v262_v8 = vld [vmem:[%s242_s6] sm:$0x3]  ;;  %v276_v9 = vrot.slane %v598_v7, 1 }
  0x12   : > { %561 = vmatpush3.bf16.msra.mxu1 %v596_v3  ;;  %553 = vmatpush3.bf16.msra.mxu0 %v597_v5 }
  0x13   : > { %562 = vmatprep.subr.bf16.mxu1 %v624_v1 }
  0x15   : > { %555 = vmatmul.mubr.msk.bf16.vlgmr.msra.gmra.mxu0 %vm286_vm2, %v276_v9 }
  0x16   : > { %563 = vmatpush3.bf16.msra.mxu1 %v599_v6 }
  0x19   : > { %565 = vmatmul.mubr.msk.bf16.vlgmr.msra.gmra.mxu1 %vm352_vm3, %v262_v8 }
  0xd5   : > { %v328_v10 = vpop.f32.mrf.mxu0 }
  0xd7   : > { %v556_v14 = vpop.f32.mrf.mxu0 }
  0xd9   : > { %v390_v11 = vpop.f32.mrf.mxu1  ;;  %v331_v17 = vpop.f32.mrf.mxu0 }
  0xda   : > { %v391_v13 = vadd.f32 %v390_v11, %v328_v10 }
  0xdb   : > { %v566_v15 = vpop.f32.mrf.mxu1  ;;  %v557_v20 = vpop.f32.mrf.mxu0 }
  0xdc   : > { %v403_v16 = vadd.f32 %v540_v12, %v391_v13 }
  0xdd   : > { %v393_v18 = vpop.f32.mrf.mxu1 }
  0xde   : > { %v404_v19 = vmul.f32 0.2, %v403_v16 }
  0xdf   : > { %v567_v21 = vpop.f32.mrf.mxu1 }
  0xe0   : > { %v405_v22 = vmax.f32 %v403_v16, %v404_v19 }
  0xe2   : > { %v406_v23 = vpack.c.bf16 %v405_v22, %v405_v22 }
  0xe4   : > { %407 = vst [vmem:[%s260_s12] sm:$0x3] %v406_v23 }
  0xe5 PF: > { %s14_s17 = sadd.s32 1, %s622_s17   ;;  %s711_s15 = smov %s618_s16 }
  0xe6   : > { %p11_p5 = scmp.ge.s32.totalorder %s14_s17, 4   ;;  %s712_s16 = smov %s714_s18 }
  0xe8   :  { %13 = sbr.rel (!%p11_p5) target bundleno = 2 (0x2), region = 75 }

// kernel: _lambda_.16
= control target key start
LH: loop header
LB: loop body
LE: loop exit
PB: predicated region body
PF: predicated region fallthrough
CT: control target
= control target key end

     0   :  { %s698_s15 = smov 0   ;;  %s700_s16 = smov 0   ;;  %s765_s0 = inlined_call_operand.vmem [shape: bf16[2,2,96], index: 0, kind: input, shape index: {}]   ;;  %s766_s1 = inlined_call_operand.vmem [shape: bf16[96,128], index: 1, kind: input, shape index: {}]   ;;  %s767_s2 = inlined_call_operand.vmem [shape: bf16[48,128], index: 2, kind: input, shape index: {}]   ;;  %s768_s3 = inlined_call_operand.vmem [shape: f32[1,128], index: 3, kind: input, shape index: {}]   ;;  %s769_s4 = inlined_call_operand.vmem [shape: bf16[2,1,128], index: 4, kind: output, shape index: {}]  }
   0x1   :  { %s702_s17 = smov 0  }
   0x2 LB: > { %s23_s18 = sadd.s32 1, %s664_s16  ;;  %p559_p0 = scmp.ge.s32.totalorder %s668_s17, 1  ;;  %s668_s17 = sphi %s702_s17, %s14_s17   ;;  %s664_s16 = sphi %s700_s16, %s771_s16   ;;  %s660_s15 = sphi %s698_s15, %s770_s15  }
   0x3   : > { %p24_p1 = scmp.ge.s32.totalorder %s23_s18, 2  ;;  %p200_p2 = scmp.lt.s32.totalorder %s668_s17, 3 }
   0x5   : > { %s773_s18 = smov (%p24_p1, %s23_s18), 0  ;;  %p201_p3 = pnand %p559_p0, %p200_p2 }
   0x6   : > { %p236_p4 = scmp.lt.s32.totalorder (!%p201_p3), %s660_s15, 1 }
   0x7   : > { %204 = sbr.rel (%p201_p3) target bundleno = 242 (0xf2), region = 36 }
   0xc   : > { %v637_v0 = vld [vmem:[%s766_s1 + $0x28] sm:$0xff]   ;;  %v670_v1 = vmov 0.0   ;;  %v638_v2 = vld [vmem:[%s766_s1 + $0x20] sm:$0xff]   ;;  %v639_v3 = vld [vmem:[%s767_s2 + $0x10] sm:$0xff]   ;;  %vm671_vm0 = vmmov 0   ;;  %s775_s15 = smov (!%p236_p4, %s660_s15), 1  ;;  %v280_v5 = vlaneseq }
   0xd   : > { %594 = vmatprep.subr.bf16.mxu1 %v670_v1  ;;  %584 = vmatprep.subr.bf16.mxu0 %v670_v1  ;;  %v641_v4 = vld [vmem:[%s767_s2 + $0x8] sm:$0xff]   ;;  %v640_v6 = vld [vmem:[%s766_s1 + $0x18] sm:$0xff]   ;;  %v643_v7 = vld [vmem:[%s767_s2] sm:$0xff]   ;;  %s238_s7 = scalar_lea.vmem %s765_s0, %s775_s15  ;;  %v672_v8 = vmov 1966171168   ;;  %vm312_vm1 = vcmask 392192   ;;  %s255_s22 = scalar_lea.vmem %s769_s4, %s775_s15 }
   0xe   : > { %595 = vmatpush3.bf16.msra.mxu1 %v637_v0  ;;  %590 = vmatprep.mubr.msk.bf16.mxu0 %vm671_vm0, %v670_v1  ;;  %v278_v9 = vunpack.c.l.s4 %v672_v8  ;;  %v281_v10 = vshrl.u32 %v280_v5, 7  ;;  %v642_v11 = vld [vmem:[%s766_s1 + $0x10] sm:$0xff]   ;;  %v257_v13 = vld [vmem:[%s238_s7] sm:$0x1]  ;;  %v644_v15 = vld [vmem:[%s766_s1 + $0x8] sm:$0xff]   ;;  %vm392_vm2 = vcmask 785408  }
   0xf   : > { %596 = vmatprep.subr.bf16.mxu1 %v670_v1  ;;  %606 = vmatprep.mubr.msk.bf16.mxu1 %vm671_vm0, %v670_v1  ;;  %v645_v18 = vld [vmem:[%s766_s1] sm:$0xff]   ;;  %vm441_vm3 = vcmask 1040384   ;;  %vm442_vm4 = vsmask.f32 256 }
  0x10   : > { %585 = vmatpush3.bf16.msra.mxu0 %v639_v3  ;;  %v279_v12 = vunpack.c.0.s8 %v278_v9  ;;  %v436_v24 = vld [vmem:[%s768_s3] sm:$0x1]  ;;  %vm443_vm5 = vmand %vm441_vm3, %vm442_vm4 }
  0x11   : > { %586 = vmatprep.subr.bf16.mxu0 %v670_v1  ;;  %v444_v33 = vld [vmem:[%s255_s22] sm:$0x1] }
  0x12   : > { %597 = vmatpush3.bf16.msra.mxu1 %v638_v2  ;;  %v282_v14 = vsub.s32 %v279_v12, %v281_v10 }
  0x13   : > { %598 = vmatprep.subr.bf16.mxu1 %v670_v1 }
  0x14   : > { %587 = vmatpush3.bf16.msra.mxu0 %v641_v4  ;;  %v283_v16 = vrot.slane %v257_v13, %v282_v14 }
  0x15   : > { %588 = vmatprep.subr.bf16.mxu0 %v670_v1 }
  0x16   : > { %599 = vmatpush3.bf16.msra.mxu1 %v640_v6  ;;  %v290_v17 = vrot.slane %v283_v16, %v282_v14 }
  0x17   : > { %600 = vmatprep.subr.bf16.mxu1 %v670_v1 }
  0x18   : > { %589 = vmatpush3.bf16.msra.mxu0 %v643_v7  ;;  %v292_v19 = vshrl.u32 %v290_v17, 16 }
  0x1a   : > { %601 = vmatpush3.bf16.msra.mxu1 %v642_v11 }
  0x1b   : > { %602 = vmatprep.subr.bf16.mxu1 %v670_v1  ;;  %591 = vmatmul.mubr.msk.bf16.vlgmr.msra.gmra.mxu0 %vm312_vm1, %v292_v19 }
  0x1e   : > { %603 = vmatpush3.bf16.msra.mxu1 %v644_v15 }
  0x1f   : > { %604 = vmatprep.subr.bf16.mxu1 %v670_v1 }
  0x22   : > { %605 = vmatpush3.bf16.msra.mxu1 %v645_v18 }
  0x25   : > { %607 = vmatmul.mubr.msk.bf16.vlgmr.msra.gmra.mxu1 %vm392_vm2, %v257_v13 }
  0xdb   : > { %v350_v20 = vpop.f32.mrf.mxu0 }
  0xdd   : > { %v592_v21 = vpop.f32.mrf.mxu0 }
  0xdf   : > { %v353_v22 = vpop.f32.mrf.mxu0 }
  0xe1   : > { %v593_v26 = vpop.f32.mrf.mxu0 }
  0xe5   : > { %v430_v23 = vpop.f32.mrf.mxu1 }
  0xe6   : > { %v431_v25 = vadd.f32 %v430_v23, %v350_v20 }
  0xe7   : > { %v608_v27 = vpop.f32.mrf.mxu1 }
  0xe8   : > { %v437_v28 = vadd.f32 %v436_v24, %v431_v25 }
  0xe9   : > { %v433_v29 = vpop.f32.mrf.mxu1 }
  0xea   : > { %v438_v30 = vmul.f32 0.2, %v437_v28 }
  0xeb   : > { %v609_v31 = vpop.f32.mrf.mxu1 }
  0xec   : > { %v439_v32 = vmax.f32 %v437_v28, %v438_v30 }
  0xee   : > { %v440_v34 = vpack.c.bf16 %v439_v32, %v439_v32 }
  0xf0   : > { %v445_v35 = vsel %vm443_vm5, %v440_v34, %v444_v33 }
  0xf1   : > { %446 = vst [vmem:[%s255_s22] sm:$0x1] %v445_v35 }
  0xf2 PF: > { %s14_s17 = sadd.s32 1, %s668_s17   ;;  %s770_s15 = smov %s664_s16 }
  0xf3   : > { %p11_p5 = scmp.ge.s32.totalorder %s14_s17, 4   ;;  %s771_s16 = smov %s773_s18 }
  0xf5   :  { %13 = sbr.rel (!%p11_p5) target bundleno = 2 (0x2), region = 75 }

// kernel: _lambda_.17
= control target key start
LH: loop header
LB: loop body
LE: loop exit
PB: predicated region body
PF: predicated region fallthrough
CT: control target
= control target key end

     0   :  { %s632_s12 = smov 0   ;;  %s634_s13 = smov 0   ;;  %s674_s0 = inlined_call_operand.vmem [shape: f32[2,2,32], index: 0, kind: input, shape index: {}]   ;;  %s675_s1 = inlined_call_operand.vmem [shape: f32[2,32,32], index: 1, kind: input, shape index: {}]   ;;  %s676_s2 = inlined_call_operand.vmem [shape: f32[2,1,32], index: 2, kind: input, shape index: {}]   ;;  %s677_s3 = inlined_call_operand.vmem [shape: f32[2,2,32], index: 3, kind: output, shape index: {}]  }
   0x1   :  { %s636_s14 = smov 0  }
   0x2 LB: > { %s39_s15 = sadd.s32 1, %s604_s13  ;;  %p534_p0 = scmp.ge.s32.totalorder %s608_s14, 1  ;;  %s608_s14 = sphi %s636_s14, %s13_s14   ;;  %s604_s13 = sphi %s634_s13, %s679_s13   ;;  %s600_s12 = sphi %s632_s12, %s678_s12  }
   0x3   : > { %p41_p1 = scmp.ge.s32.totalorder %s39_s15, 2  ;;  %p211_p2 = scmp.lt.s32.totalorder %s608_s14, 3 }
   0x5   : > { %s681_s15 = smov (%p41_p1, %s39_s15), 0  ;;  %p212_p3 = pnand %p534_p0, %p211_p2 }
   0x6   : > { %p263_p4 = scmp.lt.s32.totalorder (!%p212_p3), %s600_s12, 1 }
   0x7   : > { %215 = sbr.rel (%p212_p3) target bundleno = 229 (0xe5), region = 32 }
   0xc   : > { %vm306_vm0 = vcmask 254976   ;;  %v610_v0 = vmov 0.0   ;;  %vm611_vm1 = vmmov 0   ;;  %s683_s12 = smov (!%p263_p4, %s600_s12), 1  ;;  %vm314_vm2 = vcmask 261120  }
   0xd   : > { %549 = vmatprep.subr.mxu0 %v610_v0  ;;  %557 = vmatprep.mubr.msk.f32.mxu0 %vm611_vm1, %v610_v0  ;;  %307 = vst.msk [vmem:[#allocation2] sm:$0x3] %vm306_vm0, %v610_v0  ;;  %s543_s16 = sshll.u32 %s683_s12, 5  ;;  %s535_s20 = sshll.u32 %s683_s12, 1 }
   0xe   : > { %s284_s19 = scalar_lea.vmem %s675_s1, %s543_s16  ;;  %s272_s23 = scalar_lea.vmem %s674_s0, %s535_s20 }
   0xf   : > { %v313_v1 = vld [vmem:[%s284_s19 + $0x18] sm:$0xff]  ;;  %v312_v2 = vld [vmem:[%s284_s19 + $0x10] sm:$0xff]  ;;  %v311_v3 = vld [vmem:[%s284_s19 + $0x8] sm:$0xff]  ;;  %s291_s26 = scalar_lea.vmem %s676_s2, %s683_s12  ;;  %s301_s29 = scalar_lea.vmem %s677_s3, %s535_s20 }
  0x10   : > { %550 = vmatpush3.msra.mxu0 %v313_v1  ;;  %v310_v4 = vld [vmem:[%s284_s19] sm:$0xff] }
  0x11   : > { %551 = vmatprep.subr.mxu0 %v610_v0  ;;  %v309_v5 = vld [vmem:[%s272_s23] sm:$0x3] }
  0x12   : > { %552 = vmatpush3.msra.mxu0 %v312_v2  ;;  %v540_v10 = vld [vmem:[%s291_s26] ss:$0 sm:$0xff] }
  0x13   : > { %553 = vmatprep.subr.mxu0 %v610_v0 }
  0x14   : > { %554 = vmatpush3.msra.mxu0 %v311_v3  ;;  %v308_v6 = vld [vmem:[#allocation2] sm:$0x3] }
  0x15   : > { %555 = vmatprep.subr.mxu0 %v610_v0 }
  0x16   : > { %556 = vmatpush3.msra.mxu0 %v310_v4 }
  0x17   : > { %558 = vmatmul.mubr.msk.f32.vlgmr.msra.gmra.mxu0 %vm314_vm2, %v309_v5 }
  0xd7   : > { %v384_v7 = vpop.f32.mrf.mxu0 }
  0xd8   : > { %v388_v8 = vadd.f32 %v384_v7, %v308_v6 }
  0xd9   : > { %v559_v9 = vpop.f32.mrf.mxu0 }
  0xda   : > { %390 = vst.msk [vmem:[#allocation2] sm:$0x3] %vm306_vm0, %v388_v8 }
  0xe1   : > { %v394_v11 = vld [vmem:[#allocation2] sm:$0x3] }
  0xe2   : > { %v402_v12 = vadd.f32 %v540_v10, %v394_v11 }
  0xe4   : > { %403 = vst.msk [vmem:[%s301_s29] sm:$0x3] %vm306_vm0, %v402_v12 }
  0xe5 PF: > { %s13_s14 = sadd.s32 1, %s608_s14   ;;  %s678_s12 = smov %s604_s13 }
  0xe6   : > { %p10_p5 = scmp.ge.s32.totalorder %s13_s14, 4   ;;  %s679_s13 = smov %s681_s15 }
  0xe8   :  { %12 = sbr.rel (!%p10_p5) target bundleno = 2 (0x2), region = 76 }

</bundles_post_ra>
